<compile_context>
chip_gen: v6e
topology: v6e:2x2x1
jax: 0.10.0
libtpu: 0.0.40
codegen_flags: <defaults>
</compile_context>

<pallas_src>
import functools

import jax
import jax.numpy as jnp
from jax.experimental import pallas as pl
from jax.experimental.pallas import tpu as pltpu


# ----------------------------------------------------------------------------
# VMEM budget / tiling helpers (generation-aware)
# ----------------------------------------------------------------------------
def _vmem_caps():
    """Returns (block_budget_bytes, vmem_limit_bytes) derived from the chip."""
    try:
        cap = int(pltpu.get_tpu_info().vmem_capacity_bytes)
    except Exception:
        cap = 64 * 1024 * 1024  # v7x per-TC VMEM; conservative for v5e/v6e
    budget = int(cap * 0.55)    # what our 2-in + 2-out block buffers may use
    limit = int(cap * 0.75)     # scoped VMEM limit handed to the compiler
    return budget, limit


def _pick_batch_block(N, slab_bytes, budget):
    """How many batch items to pack per block in the fused path."""
    target = 2 * 1024 * 1024  # aim for >= 2 MiB DMA blocks
    bn = min(
        N,
        8,  # cap in-kernel unroll
        max(1, target // max(slab_bytes, 1)),
        max(1, budget // (4 * max(slab_bytes, 1))),
    )
    return max(1, int(bn))


def _pick_spatial_tile(L, C, itemsize, budget):
    """Spatial (lane-axis) tile for the two-pass fallback path."""
    per_lane_bytes = C * itemsize
    max_tile = budget // (4 * per_lane_bytes)       # 2 in-bufs + 2 out-bufs
    tile = max(128, (max_tile // 128) * 128)        # lane-aligned
    tile = min(tile, 8192)                          # bound in-kernel unroll
    tile = min(tile, max(128, pl.cdiv(L, 128) * 128))
    return int(tile)


# ----------------------------------------------------------------------------
# Fused single-pass kernel: pool + MLP + sigmoid + scale, one read / one write
# ----------------------------------------------------------------------------
def _se_fused_kernel(x_ref, w1_ref, b1_ref, w2_ref, b2_ref, o_ref, *,
                     inv_hw, bn):
    x = x_ref[...]                                            # (bn, C, L)
    pooled = jnp.sum(x.astype(jnp.float32), axis=-1,
                     keepdims=True) * inv_hw                  # (bn, C, 1)
    w1 = w1_ref[...]                                          # (Cr, C)
    b1 = b1_ref[...]                                          # (Cr, 1)
    w2 = w2_ref[...]                                          # (C, Cr)
    b2 = b2_ref[...]                                          # (C, 1)
    for n in range(bn):                                       # static unroll
        p = pooled[n]                                         # (C, 1)
        h = jnp.maximum(
            jnp.dot(w1, p, preferred_element_type=jnp.float32) + b1, 0.0)
        z = jnp.dot(w2, h, preferred_element_type=jnp.float32) + b2
        sc = jax.nn.sigmoid(z)                                # (C, 1)
        o_ref[n] = (x[n].astype(jnp.float32) * sc).astype(o_ref.dtype)


def _se_fused(x_ncl, w1, b1c, w2, b2c, *, bn, vmem_limit):
    N, C, L = x_ncl.shape
    Cr = w1.shape[0]
    return pl.pallas_call(
        functools.partial(_se_fused_kernel, inv_hw=1.0 / float(L), bn=bn),
        out_shape=jax.ShapeDtypeStruct((N, C, L), x_ncl.dtype),
        grid_spec=pltpu.PrefetchScalarGridSpec(
            num_scalar_prefetch=0,
            grid=(pl.cdiv(N, bn),),
            in_specs=[
                pl.BlockSpec((bn, C, L), lambda n: (n, 0, 0)),
                pl.BlockSpec((Cr, C), lambda n: (0, 0)),      # resident weights
                pl.BlockSpec((Cr, 1), lambda n: (0, 0)),
                pl.BlockSpec((C, Cr), lambda n: (0, 0)),
                pl.BlockSpec((C, 1), lambda n: (0, 0)),
            ],
            out_specs=pl.BlockSpec((bn, C, L), lambda n: (n, 0, 0)),
        ),
        compiler_params=pltpu.CompilerParams(
            dimension_semantics=("parallel",),
            vmem_limit_bytes=vmem_limit,
        ),
    )(x_ncl, w1, b1c, w2, b2c)


# ----------------------------------------------------------------------------
# Fallback kernel 1: tiled global-average-pool reduction + excitation MLP
# ----------------------------------------------------------------------------
def _se_scale_kernel(x_ref, w1_ref, b1_ref, w2_ref, b2_ref, s_ref, acc_ref, *,
                     inv_hw, L, tile, need_mask):
    s_idx = pl.program_id(1)

    @pl.when(s_idx == 0)
    def _():
        acc_ref[...] = jnp.zeros_like(acc_ref)

    xb = x_ref[0].astype(jnp.float32)                         # (C, tile)
    if need_mask:
        offs = s_idx * tile + jax.lax.broadcasted_iota(jnp.int32, xb.shape, 1)
        xb = jnp.where(offs < L, xb, 0.0)

    # Pure VPU adds into a (C, 128) accumulator; lane-aligned static slices.
    part = acc_ref[...]
    for j in range(tile // 128):
        part = part + xb[:, j * 128:(j + 1) * 128]
    acc_ref[...] = part

    @pl.when(s_idx == pl.num_programs(1) - 1)
    def _():
        pooled = jnp.sum(acc_ref[...], axis=-1,
                         keepdims=True) * inv_hw              # (C, 1)
        h = jnp.maximum(
            jnp.dot(w1_ref[...], pooled,
                    preferred_element_type=jnp.float32) + b1_ref[...], 0.0)
        z = jnp.dot(w2_ref[...], h,
                    preferred_element_type=jnp.float32) + b2_ref[...]
        s_ref[0] = jax.nn.sigmoid(z).astype(s_ref.dtype)      # (C, 1)


def _se_scale(x_ncl, w1, b1c, w2, b2c, *, tile, vmem_limit):
    N, C, L = x_ncl.shape
    Cr = w1.shape[0]
    S = pl.cdiv(L, tile)
    return pl.pallas_call(
        functools.partial(_se_scale_kernel, inv_hw=1.0 / float(L), L=L,
                          tile=tile, need_mask=(L % tile != 0)),
        out_shape=jax.ShapeDtypeStruct((N, C, 1), jnp.float32),
        grid_spec=pltpu.PrefetchScalarGridSpec(
            num_scalar_prefetch=0,
            grid=(N, S),
            in_specs=[
                pl.BlockSpec((1, C, tile), lambda n, s: (n, 0, s)),
                pl.BlockSpec((Cr, C), lambda n, s: (0, 0)),
                pl.BlockSpec((Cr, 1), lambda n, s: (0, 0)),
                pl.BlockSpec((C, Cr), lambda n, s: (0, 0)),
                pl.BlockSpec((C, 1), lambda n, s: (0, 0)),
            ],
            out_specs=pl.BlockSpec((1, C, 1), lambda n, s: (n, 0, 0)),
            scratch_shapes=[pltpu.VMEM((C, 128), jnp.float32)],
        ),
        compiler_params=pltpu.CompilerParams(
            dimension_semantics=("parallel", "arbitrary"),
            vmem_limit_bytes=vmem_limit,
        ),
    )(x_ncl, w1, b1c, w2, b2c)


# ----------------------------------------------------------------------------
# Fallback kernel 2: broadcast channel-wise scale over the feature map
# ----------------------------------------------------------------------------
def _se_apply_kernel(x_ref, s_ref, o_ref):
    o_ref[...] = (x_ref[...].astype(jnp.float32) * s_ref[...]).astype(o_ref.dtype)


def _se_apply(x_ncl, scale_nc1, *, tile, vmem_limit):
    N, C, L = x_ncl.shape
    S = pl.cdiv(L, tile)
    return pl.pallas_call(
        _se_apply_kernel,
        out_shape=jax.ShapeDtypeStruct((N, C, L), x_ncl.dtype),
        grid_spec=pltpu.PrefetchScalarGridSpec(
            num_scalar_prefetch=0,
            grid=(N, S),
            in_specs=[
                pl.BlockSpec((1, C, tile), lambda n, s: (n, 0, s)),
                pl.BlockSpec((1, C, 1), lambda n, s: (n, 0, 0)),
            ],
            out_specs=pl.BlockSpec((1, C, tile), lambda n, s: (n, 0, s)),
        ),
        compiler_params=pltpu.CompilerParams(
            dimension_semantics=("parallel", "parallel"),
            vmem_limit_bytes=vmem_limit,
        ),
    )(x_ncl, scale_nc1)


# ----------------------------------------------------------------------------
# SEModule forward (PyTorch-equivalent, NCHW in / NCHW out, no transposes)
# ----------------------------------------------------------------------------
def se_module_forward(x_nchw, params, *, force_two_pass=False,
                      force_spatial_tile=None):
    """x_nchw: (N, C, H, W).

    params (PyTorch conv layout): w1 (Cr, C), b1 (Cr,), w2 (C, Cr), b2 (C,).
    """
    N, C, H, W = x_nchw.shape
    L = H * W
    x = x_nchw.reshape(N, C, L)          # free view, channels on sublanes

    w1 = params["w1"]
    w2 = params["w2"]
    Cr = w1.shape[0]
    b1c = params["b1"].reshape(Cr, 1)
    b2c = params["b2"].reshape(C, 1)

    budget, limit = _vmem_caps()
    itemsize = jnp.dtype(x.dtype).itemsize
    slab_bytes = C * L * itemsize

    if (not force_two_pass) and 4 * slab_bytes <= budget:
        # Fused single-pass: x is read once and y written once.
        bn = _pick_batch_block(N, slab_bytes, budget)
        y = _se_fused(x, w1, b1c, w2, b2c, bn=bn, vmem_limit=limit)
    else:
        # Two-pass fallback for feature maps too large to hold in VMEM.
        tile = force_spatial_tile or _pick_spatial_tile(L, C, itemsize, budget)
        assert tile % 128 == 0
        scale = _se_scale(x, w1, b1c, w2, b2c, tile=tile, vmem_limit=limit)
        y = _se_apply(x, scale, tile=tile, vmem_limit=limit)

    # TODO(synk): for N==1 on v7x the squeeze pass uses only one TensorCore;
    # a 2-way spatial split of the reduction would recover the second core.
    return y.reshape(N, C, H, W)


# ----------------------------------------------------------------------------
# Pure-JAX reference for correctness checking
# ----------------------------------------------------------------------------
def se_reference(x_nchw, params):
    pooled = jnp.mean(x_nchw, axis=(2, 3))                          # (N, C)
    h = jnp.maximum(pooled @ params["w1"].T + params["b1"], 0.0)    # (N, Cr)
    s = jax.nn.sigmoid(h @ params["w2"].T + params["b2"])           # (N, C)
    return x_nchw * s[:, :, None, None]


# ----------------------------------------------------------------------------
if __name__ == "__main__":
    key = jax.random.PRNGKey(0)

    def make_params(k, C, reduction=16):
        Cr = max(1, C // reduction)
        k1, k2, k3, k4 = jax.random.split(k, 4)
        return {
            # PyTorch 1x1-conv weights on a 1x1 map == dense layers; kept in
            # conv layout (out_ch, in_ch).
            "w1": 0.1 * jax.random.normal(k1, (Cr, C), jnp.float32),
            "b1": 0.01 * jax.random.normal(k2, (Cr,), jnp.float32),
            "w2": 0.1 * jax.random.normal(k3, (C, Cr), jnp.float32),
            "b2": 0.01 * jax.random.normal(k4, (C,), jnp.float32),
        }

    def check(x, params, **kw):
        out = jax.block_until_ready(se_module_forward(x, params, **kw))
        ref = se_reference(x, params)
        assert out.shape == x.shape and out.dtype == x.dtype
        assert bool(jnp.all(jnp.isfinite(out)))
        err = float(jnp.max(jnp.abs(out - ref)))
        assert err < 1e-4, f"max abs err {err}"

    kp, kx1, kx2 = jax.random.split(key, 3)
    C = 128
    params = make_params(kp, C)

    # Case 1: typical small SE block -> fused single-pass path (bn>1 batching).
    x1 = jax.random.normal(kx1, (2, C, 16, 16), jnp.float32)
    check(x1, params)

    # Case 2: forced two-pass path (tiled reduction + apply), L % tile == 0.
    check(x1, params, force_two_pass=True, force_spatial_tile=128)

    # Case 3: forced two-pass with a ragged last spatial tile (L=400, tile=256).
    x2 = jax.random.normal(kx2, (2, C, 20, 20), jnp.float32)
    check(x2, params, force_two_pass=True, force_spatial_tile=256)

    print("KERNEL_OK")
</pallas_src>

<mosaic_0001>
module attributes {stable_mosaic.version = 11 : i64} {
  func.func @_se_fused_kernel(%arg0: i32, %arg1: memref<2x128x256xf32, #tpu.memory_space<vmem>>, %arg2: memref<8x128xf32, #tpu.memory_space<vmem>>, %arg3: memref<8x1xf32, #tpu.memory_space<vmem>>, %arg4: memref<128x8xf32, #tpu.memory_space<vmem>>, %arg5: memref<128x1xf32, #tpu.memory_space<vmem>>, %arg6: memref<2x128x256xf32, #tpu.memory_space<vmem>>) attributes {dimension_semantics = [#tpu.dimension_semantics<parallel>], iteration_bounds = array<i64: 1>, scalar_prefetch = 0 : i64, scratch_operands = 0 : i64, tpu.core_type = #tpu.core_type<tc>, window_params = [{transform_indices = @transform_0, window_bounds = array<i64: 2, 128, 256>}, {pipeline_mode = #tpu.pipeline_mode<synchronous>, transform_indices = @transform_1, window_bounds = array<i64: 8, 128>}, {pipeline_mode = #tpu.pipeline_mode<synchronous>, transform_indices = @transform_2, window_bounds = array<i64: 8, 1>}, {pipeline_mode = #tpu.pipeline_mode<synchronous>, transform_indices = @transform_3, window_bounds = array<i64: 128, 8>}, {pipeline_mode = #tpu.pipeline_mode<synchronous>, transform_indices = @transform_4, window_bounds = array<i64: 128, 1>}, {transform_indices = @transform_5, window_bounds = array<i64: 2, 128, 256>}]} {
    %c0 = arith.constant 0 : index
    %c0_0 = arith.constant 0 : index
    %c0_1 = arith.constant 0 : index
    %0 = vector.load %arg1[%c0, %c0_0, %c0_1] : memref<2x128x256xf32, #tpu.memory_space<vmem>>, vector<2x128x256xf32>
    %cst = arith.constant dense<0.000000e+00> : vector<2x128xf32>
    %1 = vector.multi_reduction <add>, %0, %cst [2] : vector<2x128x256xf32> to vector<2x128xf32>
    %2 = vector.shape_cast %1 : vector<2x128xf32> to vector<2x128x1xf32>
    %cst_2 = arith.constant 3.906250e-03 : f32
    %3 = vector.broadcast %cst_2 : f32 to vector<2x128x1xf32>
    %4 = arith.mulf %2, %3 : vector<2x128x1xf32>
    %c0_3 = arith.constant 0 : index
    %c0_4 = arith.constant 0 : index
    %5 = vector.load %arg2[%c0_3, %c0_4] : memref<8x128xf32, #tpu.memory_space<vmem>>, vector<8x128xf32>
    %c0_5 = arith.constant 0 : index
    %c0_6 = arith.constant 0 : index
    %6 = vector.load %arg3[%c0_5, %c0_6] : memref<8x1xf32, #tpu.memory_space<vmem>>, vector<8x1xf32>
    %c0_7 = arith.constant 0 : index
    %c0_8 = arith.constant 0 : index
    %7 = vector.load %arg4[%c0_7, %c0_8] : memref<128x8xf32, #tpu.memory_space<vmem>>, vector<128x8xf32>
    %c0_9 = arith.constant 0 : index
    %c0_10 = arith.constant 0 : index
    %8 = vector.load %arg5[%c0_9, %c0_10] : memref<128x1xf32, #tpu.memory_space<vmem>>, vector<128x1xf32>
    %9 = vector.extract_strided_slice %4 {offsets = [0, 0, 0], sizes = [1, 128, 1], strides = [1, 1, 1]} : vector<2x128x1xf32> to vector<1x128x1xf32>
    %10 = vector.shape_cast %9 : vector<1x128x1xf32> to vector<128x1xf32>
    %cst_11 = arith.constant dense<0.000000e+00> : vector<8x1xf32>
    %11 = tpu.matmul %5, %10, %cst_11 {dimension_numbers = #tpu.dot_dimension_numbers<[1], [0], [0], [1], [0, 0, 1, 1], [], []>} : vector<8x128xf32>, vector<128x1xf32>, vector<8x1xf32> -> vector<8x1xf32>
    %12 = arith.addf %11, %6 : vector<8x1xf32>
    %cst_12 = arith.constant 0.000000e+00 : f32
    %13 = vector.broadcast %cst_12 : f32 to vector<8x1xf32>
    %14 = arith.maximumf %12, %13 : vector<8x1xf32>
    %cst_13 = arith.constant dense<0.000000e+00> : vector<128x1xf32>
    %15 = tpu.matmul %7, %14, %cst_13 {dimension_numbers = #tpu.dot_dimension_numbers<[1], [0], [0], [1], [0, 0, 1, 1], [], []>} : vector<128x8xf32>, vector<8x1xf32>, vector<128x1xf32> -> vector<128x1xf32>
    %16 = arith.addf %15, %8 : vector<128x1xf32>
    %17 = arith.negf %16 : vector<128x1xf32>
    %18 = math.exp %17 : vector<128x1xf32>
    %cst_14 = arith.constant 1.000000e+00 : f32
    %19 = vector.broadcast %cst_14 : f32 to vector<128x1xf32>
    %20 = arith.addf %19, %18 : vector<128x1xf32>
    %21 = arith.divf %19, %20 : vector<128x1xf32>
    %22 = vector.extract_strided_slice %0 {offsets = [0, 0, 0], sizes = [1, 128, 256], strides = [1, 1, 1]} : vector<2x128x256xf32> to vector<1x128x256xf32>
    %23 = vector.shape_cast %22 : vector<1x128x256xf32> to vector<128x256xf32>
    %24 = vector.broadcast %21 : vector<128x1xf32> to vector<128x256xf32>
    %25 = arith.mulf %23, %24 : vector<128x256xf32>
    %c0_15 = arith.constant 0 : index
    %c0_16 = arith.constant 0 : index
    %c0_17 = arith.constant 0 : index
    %26 = vector.load %arg6[%c0_15, %c0_16, %c0_17] : memref<2x128x256xf32, #tpu.memory_space<vmem>>, vector<1x128x256xf32>
    %27 = vector.shape_cast %26 : vector<1x128x256xf32> to vector<128x256xf32>
    %28 = vector.shape_cast %25 : vector<128x256xf32> to vector<1x128x256xf32>
    tpu.vector_store %arg6[%c0_15, %c0_16, %c0_17], %28 {strides = array<i32>} : memref<2x128x256xf32, #tpu.memory_space<vmem>>, vector<1x128x256xf32>,
    %29 = vector.extract_strided_slice %4 {offsets = [1, 0, 0], sizes = [1, 128, 1], strides = [1, 1, 1]} : vector<2x128x1xf32> to vector<1x128x1xf32>
    %30 = vector.shape_cast %29 : vector<1x128x1xf32> to vector<128x1xf32>
    %cst_18 = arith.constant dense<0.000000e+00> : vector<8x1xf32>
    %31 = tpu.matmul %5, %30, %cst_18 {dimension_numbers = #tpu.dot_dimension_numbers<[1], [0], [0], [1], [0, 0, 1, 1], [], []>} : vector<8x128xf32>, vector<128x1xf32>, vector<8x1xf32> -> vector<8x1xf32>
    %32 = arith.addf %31, %6 : vector<8x1xf32>
    %cst_19 = arith.constant 0.000000e+00 : f32
    %33 = vector.broadcast %cst_19 : f32 to vector<8x1xf32>
    %34 = arith.maximumf %32, %33 : vector<8x1xf32>
    %cst_20 = arith.constant dense<0.000000e+00> : vector<128x1xf32>
    %35 = tpu.matmul %7, %34, %cst_20 {dimension_numbers = #tpu.dot_dimension_numbers<[1], [0], [0], [1], [0, 0, 1, 1], [], []>} : vector<128x8xf32>, vector<8x1xf32>, vector<128x1xf32> -> vector<128x1xf32>
    %36 = arith.addf %35, %8 : vector<128x1xf32>
    %37 = arith.negf %36 : vector<128x1xf32>
    %38 = math.exp %37 : vector<128x1xf32>
    %cst_21 = arith.constant 1.000000e+00 : f32
    %39 = vector.broadcast %cst_21 : f32 to vector<128x1xf32>
    %40 = arith.addf %39, %38 : vector<128x1xf32>
    %41 = arith.divf %39, %40 : vector<128x1xf32>
    %42 = vector.extract_strided_slice %0 {offsets = [1, 0, 0], sizes = [1, 128, 256], strides = [1, 1, 1]} : vector<2x128x256xf32> to vector<1x128x256xf32>
    %43 = vector.shape_cast %42 : vector<1x128x256xf32> to vector<128x256xf32>
    %44 = vector.broadcast %41 : vector<128x1xf32> to vector<128x256xf32>
    %45 = arith.mulf %43, %44 : vector<128x256xf32>
    %c1 = arith.constant 1 : index
    %c0_22 = arith.constant 0 : index
    %c0_23 = arith.constant 0 : index
    %46 = vector.load %arg6[%c1, %c0_22, %c0_23] : memref<2x128x256xf32, #tpu.memory_space<vmem>>, vector<1x128x256xf32>
    %47 = vector.shape_cast %46 : vector<1x128x256xf32> to vector<128x256xf32>
    %48 = vector.shape_cast %45 : vector<128x256xf32> to vector<1x128x256xf32>
    tpu.vector_store %arg6[%c1, %c0_22, %c0_23], %48 {strides = array<i32>} : memref<2x128x256xf32, #tpu.memory_space<vmem>>, vector<1x128x256xf32>,
    return
  }
  func.func @transform_0(%arg0: i32) -> (i32, i32, i32) {
    %c0_i32 = arith.constant 0 : i32
    %c0_i32_0 = arith.constant 0 : i32
    %c0_i32_1 = arith.constant 0 : i32
    return %arg0, %c0_i32, %c0_i32_0 : i32, i32, i32
  }
  func.func @transform_1(%arg0: i32) -> (i32, i32) {
    %c0_i32 = arith.constant 0 : i32
    %c0_i32_0 = arith.constant 0 : i32
    %c0_i32_1 = arith.constant 0 : i32
    return %c0_i32, %c0_i32_0 : i32, i32
  }
  func.func @transform_2(%arg0: i32) -> (i32, i32) {
    %c0_i32 = arith.constant 0 : i32
    %c0_i32_0 = arith.constant 0 : i32
    %c0_i32_1 = arith.constant 0 : i32
    return %c0_i32, %c0_i32_0 : i32, i32
  }
  func.func @transform_3(%arg0: i32) -> (i32, i32) {
    %c0_i32 = arith.constant 0 : i32
    %c0_i32_0 = arith.constant 0 : i32
    %c0_i32_1 = arith.constant 0 : i32
    return %c0_i32, %c0_i32_0 : i32, i32
  }
  func.func @transform_4(%arg0: i32) -> (i32, i32) {
    %c0_i32 = arith.constant 0 : i32
    %c0_i32_0 = arith.constant 0 : i32
    %c0_i32_1 = arith.constant 0 : i32
    return %c0_i32, %c0_i32_0 : i32, i32
  }
  func.func @transform_5(%arg0: i32) -> (i32, i32, i32) {
    %c0_i32 = arith.constant 0 : i32
    %c0_i32_0 = arith.constant 0 : i32
    %c0_i32_1 = arith.constant 0 : i32
    return %arg0, %c0_i32, %c0_i32_0 : i32, i32, i32
  }
}

</mosaic_0001>

<bundles_post_ra>
// kernel: tpu_custom_call.1
= control target key start
LH: loop header
LB: loop body
LE: loop exit
PB: predicated region body
PF: predicated region fallthrough
CT: control target
= control target key end

     0   :  { %10 = vsyncpa [#allocation3], 0  ;;  %s2142_s0 = inlined_call_operand.hbm [shape: f32[2,128,256], index: 0, kind: input, shape index: {}]   ;;  %s2143_s1 = inlined_call_operand.vmem [shape: f32[8,128], index: 1, kind: input, shape index: {}]   ;;  %s2144_s2 = inlined_call_operand.vmem [shape: f32[8,1], index: 2, kind: input, shape index: {}]   ;;  %s2145_s3 = inlined_call_operand.vmem [shape: f32[128,8], index: 3, kind: input, shape index: {}]   ;;  %s2146_s4 = inlined_call_operand.vmem [shape: f32[128,1], index: 4, kind: input, shape index: {}]   ;;  %s2147_s5 = inlined_call_operand.hbm [shape: f32[2,128,256], index: 5, kind: output, shape index: {}]  }
   0x1   :  { %11 = vsyncpa [#allocation4], 0  ;;  %s1723_s18 = smov [#allocation2]  }
   0x2   :  { %s17_s19 = sshll.u32 %s1723_s18, 4  ;;  %s18_s19 = int_to_ptr.vmem [resolvable:$true] %s17_s19 }
   0x3   :  { %s1687_s20 = scalar_lea.vmem %s18_s19, 8192  ;;  %p1692_p1 = scmp.lt.s32.totalorder %s18_s19, %s18_s19 }
   0x4   :  { %p1688_p0 = scmp.ne.s32.totalorder %s18_s19, %s1687_s20  ;;  %p1693_p2 = scmp.lt.s32.totalorder %s1687_s20, %s1687_s20 }
   0x6   :  { %p1694_p3 = por %p1693_p2, %p1692_p1 }
   0x8   :  { %p1695_p4 = pnand %p1694_p3, %p1688_p0 }
   0xa   :  { %1698 = shalt.err (!%p1695_p4)
}
   0xb   :  { %s1724_s21 = smov 256   ;;  %s1725_s22 = smov 16  }
   0xc   :  { %23 = dma.hbm_to_vmem [thread:$0]  %s2142_s0, 8192, %s18_s19, [#allocation3], %s1724_s21, %s1724_s21, %s1725_s22  }
   0xd   :  { %1719 = dma.done.wait [#allocation3], 8192  }
   0xe   :  { %1720 = vsyncadd [#allocation3], 4294959104  ;;  %v65_v0 = vld [vmem:[#allocation2 + $0xf0] sm:$0xff]  ;;  %v66_v1 = vld [vmem:[#allocation2 + $0xf8] sm:$0xff]  ;;  %v1726_v28 = vmov 0.0   ;;  %vm1727_vm0 = vmmov 0  }
   0xf   :  { %v63_v2 = vld [vmem:[#allocation2 + $0xe0] sm:$0xff]  ;;  %v144_v3 = vadd.f32 %v66_v1, %v65_v0  ;;  %v64_v4 = vld [vmem:[#allocation2 + $0xe8] sm:$0xff]  ;;  %v61_v5 = vld [vmem:[#allocation2 + $0xd0] sm:$0xff]  ;;  %1372 = vmatprep.subr.mxu0 %v1726_v28  ;;  %1404 = vmatprep.mubr.msk.f32.mxu0 %vm1727_vm0, %v1726_v28  ;;  %vm332_vm1 = vcmask 64512  }
  0x10   :  { %v62_v6 = vld [vmem:[#allocation2 + $0xd8] sm:$0xff]  ;;  %v59_v8 = vld [vmem:[#allocation2 + $0xc0] sm:$0xff]  ;;  %v60_v9 = vld [vmem:[#allocation2 + $0xc8] sm:$0xff]  ;;  %v141_v10 = vadd.f32 %v64_v4, %v63_v2 }
  0x11   :  { %v138_v7 = vadd.f32 %v62_v6, %v61_v5  ;;  %145 = vadd.xlane.f32.xlu0 %v144_v3  ;;  %v135_v11 = vadd.f32 %v60_v9, %v59_v8  ;;  %v57_v12 = vld [vmem:[#allocation2 + $0xb0] sm:$0xff]  ;;  %v58_v13 = vld [vmem:[#allocation2 + $0xb8] sm:$0xff]  ;;  %v55_v14 = vld [vmem:[#allocation2 + $0xa0] sm:$0xff] }
  0x12   :  { %v56_v15 = vld [vmem:[#allocation2 + $0xa8] sm:$0xff]  ;;  %v132_v16 = vadd.f32 %v58_v13, %v57_v12  ;;  %v1766_v18 = vld [vmem:[#allocation2 + $0x90] sm:$0xff]  ;;  %v1768_v19 = vld [vmem:[#allocation2 + $0x98] sm:$0xff] }
  0x13   :  { %139 = vadd.xlane.f32.xlu1 %v138_v7  ;;  %v129_v17 = vadd.f32 %v56_v15, %v55_v14  ;;  %v51_v20 = vld [vmem:[#allocation2 + $0x80] sm:$0xff]  ;;  %v52_v21 = vld [vmem:[#allocation2 + $0x88] sm:$0xff]  ;;  %v126_v22 = vadd.f32 %v1768_v19, %v1766_v18  ;;  %v1772_v24 = vld [vmem:[#allocation2 + $0x70] sm:$0xff] }
  0x14   :  { %v123_v23 = vadd.f32 %v52_v21, %v51_v20  ;;  %v1774_v25 = vld [vmem:[#allocation2 + $0x78] sm:$0xff]  ;;  %v1776_v26 = vld [vmem:[#allocation2 + $0x60] sm:$0xff]  ;;  %v1778_v27 = vld [vmem:[#allocation2 + $0x68] sm:$0xff] }
  0x15   :  { %142 = vadd.xlane.f32.xlu0 %v141_v10  ;;  %v120_v29 = vadd.f32 %v1774_v25, %v1772_v24  ;;  %v117_v30 = vadd.f32 %v1778_v27, %v1776_v26  ;;  %v1785_v31 = vld [vmem:[#allocation2 + $0x50] sm:$0xff]  ;;  %v1787_v32 = vld [vmem:[#allocation2 + $0x58] sm:$0xff]  ;;  %v1789_v33 = vld [vmem:[#allocation2 + $0x40] sm:$0xff] }
  0x16   :  { %v1791_v34 = vld [vmem:[#allocation2 + $0x48] sm:$0xff]  ;;  %v114_v35 = vadd.f32 %v1787_v32, %v1785_v31  ;;  %v1797_v37 = vld [vmem:[#allocation2 + $0x30] sm:$0xff]  ;;  %v1799_v38 = vld [vmem:[#allocation2 + $0x38] sm:$0xff] }
  0x17   :  { %136 = vadd.xlane.f32.xlu1 %v135_v11  ;;  %v111_v36 = vadd.f32 %v1791_v34, %v1789_v33  ;;  %v1801_v39 = vld [vmem:[#allocation2 + $0x20] sm:$0xff]  ;;  %v1803_v40 = vld [vmem:[#allocation2 + $0x28] sm:$0xff]  ;;  %v108_v41 = vadd.f32 %v1799_v38, %v1797_v37  ;;  %v1809_v43 = vld [vmem:[#allocation2 + $0x10] sm:$0xff] }
  0x18   :  { %v105_v42 = vadd.f32 %v1803_v40, %v1801_v39  ;;  %v1811_v44 = vld [vmem:[#allocation2 + $0x18] sm:$0xff]  ;;  %v1813_v45 = vld [vmem:[#allocation2] sm:$0xff]  ;;  %v1815_v46 = vld [vmem:[#allocation2 + $0x8] sm:$0xff] }
  0x19   :  { %133 = vadd.xlane.f32.xlu0 %v132_v16  ;;  %v102_v47 = vadd.f32 %v1811_v44, %v1809_v43  ;;  %v99_v48 = vadd.f32 %v1815_v46, %v1813_v45  ;;  %v97_v49 = vld [vmem:[#allocation2 + $0x1f0] sm:$0xff]  ;;  %v98_v50 = vld [vmem:[#allocation2 + $0x1f8] sm:$0xff]  ;;  %v95_v51 = vld [vmem:[#allocation2 + $0x1e0] sm:$0xff] }
  0x1a   :  { %v192_v52 = vadd.f32 %v98_v50, %v97_v49  ;;  %v96_v53 = vld [vmem:[#allocation2 + $0x1e8] sm:$0xff]  ;;  %v93_v54 = vld [vmem:[#allocation2 + $0x1d0] sm:$0xff]  ;;  %v94_v55 = vld [vmem:[#allocation2 + $0x1d8] sm:$0xff] }
  0x1b   :  { %130 = vadd.xlane.f32.xlu1 %v129_v17  ;;  %v189_v56 = vadd.f32 %v96_v53, %v95_v51  ;;  %v91_v57 = vld [vmem:[#allocation2 + $0x1c0] sm:$0xff]  ;;  %v92_v58 = vld [vmem:[#allocation2 + $0x1c8] sm:$0xff]  ;;  %v186_v59 = vadd.f32 %v94_v55, %v93_v54  ;;  %v89_v61 = vld [vmem:[#allocation2 + $0x1b0] sm:$0xff] }
  0x1c   :  { %v183_v60 = vadd.f32 %v92_v58, %v91_v57  ;;  %v90_v62 = vld [vmem:[#allocation2 + $0x1b8] sm:$0xff]  ;;  %v87_v63 = vld [vmem:[#allocation2 + $0x1a0] sm:$0xff]  ;;  %v88_v0 = vld [vmem:[#allocation2 + $0x1a8] sm:$0xff] }
  0x1d   :  { %127 = vadd.xlane.f32.xlu0 %v126_v22  ;;  %v180_v1 = vadd.f32 %v90_v62, %v89_v61  ;;  %v177_v2 = vadd.f32 %v88_v0, %v87_v63  ;;  %v85_v3 = vld [vmem:[#allocation2 + $0x190] sm:$0xff]  ;;  %v86_v4 = vld [vmem:[#allocation2 + $0x198] sm:$0xff]  ;;  %v83_v5 = vld [vmem:[#allocation2 + $0x180] sm:$0xff] }
  0x1e   :  { %v84_v6 = vld [vmem:[#allocation2 + $0x188] sm:$0xff]  ;;  %v174_v7 = vadd.f32 %v86_v4, %v85_v3  ;;  %v81_v9 = vld [vmem:[#allocation2 + $0x170] sm:$0xff]  ;;  %v82_v10 = vld [vmem:[#allocation2 + $0x178] sm:$0xff] }
  0x1f   :  { %124 = vadd.xlane.f32.xlu1 %v123_v23  ;;  %v171_v8 = vadd.f32 %v84_v6, %v83_v5  ;;  %v79_v11 = vld [vmem:[#allocation2 + $0x160] sm:$0xff]  ;;  %v80_v12 = vld [vmem:[#allocation2 + $0x168] sm:$0xff]  ;;  %v168_v13 = vadd.f32 %v82_v10, %v81_v9  ;;  %v77_v15 = vld [vmem:[#allocation2 + $0x150] sm:$0xff] }
  0x20   :  { %v165_v14 = vadd.f32 %v80_v12, %v79_v11  ;;  %v78_v16 = vld [vmem:[#allocation2 + $0x158] sm:$0xff]  ;;  %v75_v17 = vld [vmem:[#allocation2 + $0x140] sm:$0xff]  ;;  %v76_v20 = vld [vmem:[#allocation2 + $0x148] sm:$0xff] }
  0x21   :  { %121 = vadd.xlane.f32.xlu0 %v120_v29  ;;  %v162_v21 = vadd.f32 %v78_v16, %v77_v15  ;;  %v159_v22 = vadd.f32 %v76_v20, %v75_v17  ;;  %v73_v23 = vld [vmem:[#allocation2 + $0x130] sm:$0xff]  ;;  %v74_v29 = vld [vmem:[#allocation2 + $0x138] sm:$0xff]  ;;  %v68_v49 = vld [vmem:[#allocation2 + $0x108] sm:$0xff] }
  0x23   :  { %118 = vadd.xlane.f32.xlu1 %v117_v30  ;;  %v71_v30 = vld [vmem:[#allocation2 + $0x120] sm:$0xff] }
  0x25   :  { %115 = vadd.xlane.f32.xlu0 %v114_v35  ;;  %v72_v35 = vld [vmem:[#allocation2 + $0x128] sm:$0xff] }
  0x27   :  { %112 = vadd.xlane.f32.xlu1 %v111_v36  ;;  %v156_v36 = vadd.f32 %v74_v29, %v73_v23  ;;  %v229_v23 = vld [vmem:[%s2145_s3] sm:$0xff] }
  0x28   :  { %1409 = vmatprep.mubr.msk.f32.mxu1 %vm332_vm1, %v229_v23 }
  0x29   :  { %109 = vadd.xlane.f32.xlu0 %v108_v41  ;;  %v153_v41 = vadd.f32 %v72_v35, %v71_v30 }
  0x2b   :  { %106 = vadd.xlane.f32.xlu1 %v105_v42  ;;  %v69_v42 = vld [vmem:[#allocation2 + $0x110] sm:$0xff] }
  0x2d   :  { %103 = vadd.xlane.f32.xlu0 %v102_v47  ;;  %v70_v47 = vld [vmem:[#allocation2 + $0x118] sm:$0xff] }
  0x2e   :  { %v150_v50 = vadd.f32 %v70_v47, %v69_v42 }
  0x2f   :  { %100 = vadd.xlane.f32.xlu1 %v99_v48  ;;  %v67_v48 = vld [vmem:[#allocation2 + $0x100] sm:$0xff] }
  0x30   :  { %v147_v51 = vadd.f32 %v68_v49, %v67_v48 }
  0x31   :  { %193 = vadd.xlane.f32.xlu0 %v192_v52 }
  0x33   :  { %190 = vadd.xlane.f32.xlu1 %v189_v56 }
  0x35   :  { %187 = vadd.xlane.f32.xlu0 %v186_v59 }
  0x37   :  { %184 = vadd.xlane.f32.xlu1 %v183_v60 }
  0x39   :  { %181 = vadd.xlane.f32.xlu0 %v180_v1 }
  0x3b   :  { %178 = vadd.xlane.f32.xlu1 %v177_v2 }
  0x3d   :  { %175 = vadd.xlane.f32.xlu0 %v174_v7 }
  0x3f   :  { %172 = vadd.xlane.f32.xlu1 %v171_v8 }
  0x41   :  { %169 = vadd.xlane.f32.xlu0 %v168_v13 }
  0x43   :  { %166 = vadd.xlane.f32.xlu1 %v165_v14 }
  0x45   :  { %163 = vadd.xlane.f32.xlu0 %v162_v21 }
  0x47   :  { %160 = vadd.xlane.f32.xlu1 %v159_v22  ;;  %v1840_v22 = vld [vmem:[%s2143_s1] sm:$0xff] }
  0x49   :  { %157 = vadd.xlane.f32.xlu0 %v156_v36 }
  0x4b   :  { %154 = vadd.xlane.f32.xlu1 %v153_v41  ;;  %v1852_v41 = vld [vmem:[%s2144_s2] sm:$0xff] }
  0x4d   :  { %151 = vadd.xlane.f32.xlu0 %v150_v50 }
  0x4f   :  { %148 = vadd.xlane.f32.xlu1 %v147_v51 }
  0x9a   :  { %v146_v52 = vpop.xlane.xlu0 %145 }
  0x9b   :  { %v210_v53 = vmul.f32 0.00390625, %v146_v52 }
  0x9c   :  { %v140_v54 = vpop.xlane.xlu1 %139 }
  0x9d   :  { %1373 = vmatpush3.msra.mxu0 %v210_v53  ;;  %v208_v58 = vmul.f32 0.00390625, %v140_v54  ;;  %v1858_v53 = vld [vmem:[%s2145_s3 + $0x8] sm:$0xff]  ;;  %v1863_v54 = vld [vmem:[%s2145_s3 + $0x10] sm:$0xff] }
  0x9e   :  { %v143_v55 = vpop.xlane.xlu0 %142  ;;  %1374 = vmatprep.subr.mxu0 %v1726_v28 }
  0x9f   :  { %v209_v56 = vmul.f32 0.00390625, %v143_v55 }
  0xa0   :  { %v137_v57 = vpop.xlane.xlu1 %136 }
  0xa1   :  { %1375 = vmatpush3.msra.mxu0 %v209_v56  ;;  %v207_v59 = vmul.f32 0.00390625, %v137_v57 }
  0xa2   :  { %1376 = vmatprep.subr.mxu0 %v1726_v28  ;;  %v134_v60 = vpop.xlane.xlu0 %133 }
  0xa3   :  { %1377 = vmatpush3.msra.mxu0 %v208_v58  ;;  %v206_v61 = vmul.f32 0.00390625, %v134_v60  ;;  %v1879_v60 = vld [vmem:[%s2145_s3 + $0x20] sm:$0xff] }
  0xa4   :  { %v131_v62 = vpop.xlane.xlu1 %130  ;;  %1378 = vmatprep.subr.mxu0 %v1726_v28 }
  0xa5   :  { %1379 = vmatpush3.msra.mxu0 %v207_v59  ;;  %v205_v63 = vmul.f32 0.00390625, %v131_v62  ;;  %v1873_v59 = vld [vmem:[%s2145_s3 + $0x18] sm:$0xff] }
  0xa6   :  { %1380 = vmatprep.subr.mxu0 %v1726_v28  ;;  %v128_v0 = vpop.xlane.xlu0 %127 }
  0xa7   :  { %1381 = vmatpush3.msra.mxu0 %v206_v61  ;;  %v204_v1 = vmul.f32 0.00390625, %v128_v0  ;;  %v1889_v0 = vld [vmem:[%s2145_s3 + $0x28] sm:$0xff] }
  0xa8   :  { %v125_v2 = vpop.xlane.xlu1 %124  ;;  %1382 = vmatprep.subr.mxu0 %v1726_v28 }
  0xa9   :  { %1383 = vmatpush3.msra.mxu0 %v205_v63  ;;  %v203_v3 = vmul.f32 0.00390625, %v125_v2 }
  0xaa   :  { %1384 = vmatprep.subr.mxu0 %v1726_v28  ;;  %v122_v4 = vpop.xlane.xlu0 %121 }
  0xab   :  { %1385 = vmatpush3.msra.mxu0 %v204_v1  ;;  %v202_v5 = vmul.f32 0.00390625, %v122_v4  ;;  %v1895_v1 = vld [vmem:[%s2145_s3 + $0x30] sm:$0xff] }
  0xac   :  { %v119_v6 = vpop.xlane.xlu1 %118  ;;  %1386 = vmatprep.subr.mxu0 %v1726_v28 }
  0xad   :  { %1387 = vmatpush3.msra.mxu0 %v203_v3  ;;  %v201_v7 = vmul.f32 0.00390625, %v119_v6  ;;  %v1911_v6 = vld [vmem:[%s2145_s3 + $0x40] sm:$0xff] }
  0xae   :  { %1388 = vmatprep.subr.mxu0 %v1726_v28  ;;  %v116_v8 = vpop.xlane.xlu0 %115 }
  0xaf   :  { %1389 = vmatpush3.msra.mxu0 %v202_v5  ;;  %v200_v9 = vmul.f32 0.00390625, %v116_v8  ;;  %v1905_v5 = vld [vmem:[%s2145_s3 + $0x38] sm:$0xff] }
  0xb0   :  { %v113_v10 = vpop.xlane.xlu1 %112  ;;  %1390 = vmatprep.subr.mxu0 %v1726_v28 }
  0xb1   :  { %1391 = vmatpush3.msra.mxu0 %v201_v7  ;;  %v199_v11 = vmul.f32 0.00390625, %v113_v10 }
  0xb2   :  { %1392 = vmatprep.subr.mxu0 %v1726_v28  ;;  %v110_v12 = vpop.xlane.xlu0 %109 }
  0xb3   :  { %1393 = vmatpush3.msra.mxu0 %v200_v9  ;;  %v198_v13 = vmul.f32 0.00390625, %v110_v12  ;;  %v239_v12 = vld [vmem:[%s2145_s3 + $0x50] sm:$0xff] }
  0xb4   :  { %v107_v14 = vpop.xlane.xlu1 %106  ;;  %1394 = vmatprep.subr.mxu0 %v1726_v28 }
  0xb5   :  { %1395 = vmatpush3.msra.mxu0 %v199_v11  ;;  %v197_v15 = vmul.f32 0.00390625, %v107_v14  ;;  %v1921_v11 = vld [vmem:[%s2145_s3 + $0x48] sm:$0xff] }
  0xb6   :  { %1396 = vmatprep.subr.mxu0 %v1726_v28  ;;  %v104_v16 = vpop.xlane.xlu0 %103 }
  0xb7   :  { %1397 = vmatpush3.msra.mxu0 %v198_v13  ;;  %v196_v17 = vmul.f32 0.00390625, %v104_v16  ;;  %v1934_v16 = vld [vmem:[%s2145_s3 + $0x58] sm:$0xff] }
  0xb8   :  { %v101_v20 = vpop.xlane.xlu1 %100  ;;  %1398 = vmatprep.subr.mxu0 %v1726_v28 }
  0xb9   :  { %1399 = vmatpush3.msra.mxu0 %v197_v15  ;;  %v195_v21 = vmul.f32 0.00390625, %v101_v20 }
  0xba   :  { %1400 = vmatprep.subr.mxu0 %v1726_v28  ;;  %v194_v29 = vpop.xlane.xlu0 %193 }
  0xbb   :  { %1401 = vmatpush3.msra.mxu0 %v196_v17  ;;  %v226_v52 = vmul.f32 0.00390625, %v194_v29  ;;  %v1940_v17 = vld [vmem:[%s2145_s3 + $0x60] sm:$0xff]  ;;  %v1950_v29 = vld [vmem:[%s2145_s3 + $0x68] sm:$0xff] }
  0xbc   :  { %1402 = vmatprep.subr.mxu0 %v1726_v28  ;;  %v191_v30 = vpop.xlane.xlu1 %190 }
  0xbd   :  { %1403 = vmatpush3.msra.mxu0 %v195_v21  ;;  %v225_v56 = vmul.f32 0.00390625, %v191_v30 }
  0xbe   :  { %1405 = vmatmul.mubr.f32.vlgmr.msra.gmra.mxu0 %v1840_v22  ;;  %v188_v35 = vpop.xlane.xlu0 %187 }
  0xbf   :  { %1470 = vmatprep.mubr.msk.f32.mxu0 %vm332_vm1, %v229_v23  ;;  %v224_v58 = vmul.f32 0.00390625, %v188_v35  ;;  %v1956_v35 = vld [vmem:[%s2145_s3 + $0x70] sm:$0xff] }
  0xc0   :  { %v185_v36 = vpop.xlane.xlu1 %184 }
  0xc1   :  { %v223_v61 = vmul.f32 0.00390625, %v185_v36 }
  0xc2   :  { %v182_v42 = vpop.xlane.xlu0 %181 }
  0xc3   :  { %v222_v63 = vmul.f32 0.00390625, %v182_v42 }
  0xc4   :  { %v179_v49 = vpop.xlane.xlu1 %178 }
  0xc5   :  { %v221_v3 = vmul.f32 0.00390625, %v179_v49 }
  0xc6   :  { %v176_v55 = vpop.xlane.xlu0 %175 }
  0xc7   :  { %v220_v4 = vmul.f32 0.00390625, %v176_v55  ;;  %v1985_v55 = vld [vmem:[%s2146_s4] sm:$0xff] }
  0xc8   :  { %v173_v57 = vpop.xlane.xlu1 %172 }
  0xc9   :  { %v219_v8 = vmul.f32 0.00390625, %v173_v57 }
  0xca   :  { %v170_v62 = vpop.xlane.xlu0 %169 }
  0xcb   :  { %v218_v10 = vmul.f32 0.00390625, %v170_v62  ;;  %v1997_v62 = vld [vmem:[%s2146_s4 + $0x10] sm:$0xff] }
  0xcc   :  { %v167_v2 = vpop.xlane.xlu1 %166 }
  0xcd   :  { %v217_v13 = vmul.f32 0.00390625, %v167_v2 }
  0xce   :  { %v164_v7 = vpop.xlane.xlu0 %163 }
  0xcf   :  { %v216_v15 = vmul.f32 0.00390625, %v164_v7 }
  0xd0   :  { %v161_v9 = vpop.xlane.xlu1 %160 }
  0xd1   :  { %v215_v21 = vmul.f32 0.00390625, %v161_v9 }
  0xd2   :  { %v158_v14 = vpop.xlane.xlu0 %157 }
  0xd3   :  { %v214_v23 = vmul.f32 0.00390625, %v158_v14 }
  0xd4   :  { %v155_v20 = vpop.xlane.xlu1 %154 }
  0xd5   :  { %v213_v36 = vmul.f32 0.00390625, %v155_v20 }
  0xd6   :  { %v152_v30 = vpop.xlane.xlu0 %151 }
  0xd8   :  { %v149_v42 = vpop.xlane.xlu1 %148 }
  0xd9   :  { %v211_v49 = vmul.f32 0.00390625, %v149_v42  ;;  %v2022_v42 = vld [vmem:[%s2146_s4 + $0x30] sm:$0xff] }
  0xda   :  { %2152 = vst [vmem:[#allocation8_spill] sm:$0xff] %v2022_v42 }
 0x17e   :  { %v327_v47 = vpop.f32.mrf.mxu0 }
 0x17f   :  { %v328_v48 = vadd.f32 %v327_v47, %v1852_v41  ;;  %v212_v47 = vmul.f32 0.00390625, %v152_v30 }
 0x180   :  { %v1406_v50 = vpop.f32.mrf.mxu0 }
 0x181   :  { %v331_v51 = vmax.f32 %v328_v48, 0.0  ;;  %v1966_v48 = vld [vmem:[%s2145_s3 + $0x78] sm:$0xff]  ;;  %v1728_v50 = vmov 0  }
 0x182   :  { %1503 = vset.pattern.permute.xlu1 %v1728_v50  ;;  %1504 = vset.pattern.permute.xlu0 %v1728_v50 }
 0x183   :  { %1407 = vmatprep.subr.mxu1 %v331_v51 }
 0x184   :  { %1408 = vmatpush3.msra.mxu1 %v331_v51  ;;  %v1980_v51 = vld [vmem:[%s2146_s4 + $0x8] sm:$0xff] }
 0x185   :  { %1410 = vmatmul.mubr.msk.f32.vlgmr.msra.gmra.mxu1 %vm332_vm1, %v1858_v53  ;;  %1433 = vmatprep.subr.mxu1 %v1726_v28 }
 0x186   :  { %1434 = vmatpush3.msra.mxu1 %v226_v52  ;;  %1412 = vmatprep.mubr.msk.f32.mxu1 %vm332_vm1, %v1863_v54 }
 0x187   :  { %1435 = vmatprep.subr.mxu1 %v1726_v28 }
 0x188   :  { %1436 = vmatpush3.msra.mxu1 %v225_v56 }
 0x189   :  { %1413 = vmatmul.mubr.msk.f32.gmra.mxu1 %vm332_vm1, %v1873_v59  ;;  %1437 = vmatprep.subr.mxu1 %v1726_v28 }
 0x18a   :  { %1438 = vmatpush3.msra.mxu1 %v224_v58  ;;  %1415 = vmatprep.mubr.msk.f32.mxu1 %vm332_vm1, %v1879_v60 }
 0x18b   :  { %1439 = vmatprep.subr.mxu1 %v1726_v28 }
 0x18c   :  { %1440 = vmatpush3.msra.mxu1 %v223_v61 }
 0x18d   :  { %1416 = vmatmul.mubr.msk.f32.gmra.mxu1 %vm332_vm1, %v1889_v0  ;;  %1441 = vmatprep.subr.mxu1 %v1726_v28 }
 0x18e   :  { %1442 = vmatpush3.msra.mxu1 %v222_v63  ;;  %1418 = vmatprep.mubr.msk.f32.mxu1 %vm332_vm1, %v1895_v1 }
 0x18f   :  { %1443 = vmatprep.subr.mxu1 %v1726_v28 }
 0x190   :  { %1444 = vmatpush3.msra.mxu1 %v221_v3 }
 0x191   :  { %1419 = vmatmul.mubr.msk.f32.gmra.mxu1 %vm332_vm1, %v1905_v5  ;;  %1445 = vmatprep.subr.mxu1 %v1726_v28 }
 0x192   :  { %1446 = vmatpush3.msra.mxu1 %v220_v4  ;;  %1421 = vmatprep.mubr.msk.f32.mxu1 %vm332_vm1, %v1911_v6  ;;  %v2003_v4 = vld [vmem:[%s2146_s4 + $0x28] sm:$0xff] }
 0x193   :  { %1447 = vmatprep.subr.mxu1 %v1726_v28 }
 0x194   :  { %1448 = vmatpush3.msra.mxu1 %v219_v8 }
 0x195   :  { %1422 = vmatmul.mubr.msk.f32.gmra.mxu1 %vm332_vm1, %v1921_v11  ;;  %1449 = vmatprep.subr.mxu1 %v1726_v28 }
 0x196   :  { %1450 = vmatpush3.msra.mxu1 %v218_v10  ;;  %1424 = vmatprep.mubr.msk.f32.mxu1 %vm332_vm1, %v239_v12  ;;  %v2009_v10 = vld [vmem:[%s2146_s4 + $0x20] sm:$0xff] }
 0x197   :  { %1451 = vmatprep.subr.mxu1 %v1726_v28 }
 0x198   :  { %1452 = vmatpush3.msra.mxu1 %v217_v13 }
 0x199   :  { %1425 = vmatmul.mubr.msk.f32.gmra.mxu1 %vm332_vm1, %v1934_v16  ;;  %1453 = vmatprep.subr.mxu1 %v1726_v28 }
 0x19a   :  { %1454 = vmatpush3.msra.mxu1 %v216_v15  ;;  %1427 = vmatprep.mubr.msk.f32.mxu1 %vm332_vm1, %v1940_v17  ;;  %v2015_v15 = vld [vmem:[%s2146_s4 + $0x38] sm:$0xff] }
 0x19b   :  { %1455 = vmatprep.subr.mxu1 %v1726_v28 }
 0x19c   :  { %1456 = vmatpush3.msra.mxu1 %v215_v21 }
 0x19d   :  { %1428 = vmatmul.mubr.msk.f32.gmra.mxu1 %vm332_vm1, %v1950_v29  ;;  %1457 = vmatprep.subr.mxu1 %v1726_v28 }
 0x19e   :  { %1458 = vmatpush3.msra.mxu1 %v214_v23  ;;  %1430 = vmatprep.mubr.msk.f32.mxu1 %vm332_vm1, %v1956_v35 }
 0x19f   :  { %1459 = vmatprep.subr.mxu1 %v1726_v28 }
 0x1a0   :  { %1460 = vmatpush3.msra.mxu1 %v213_v36 }
 0x1a1   :  { %1431 = vmatmul.mubr.msk.f32.gmra.mxu1 %vm332_vm1, %v1966_v48  ;;  %1461 = vmatprep.subr.mxu1 %v1726_v28 }
 0x1a2   :  { %1462 = vmatpush3.msra.mxu1 %v212_v47  ;;  %1465 = vmatprep.mubr.msk.f32.mxu1 %vm1727_vm0, %v1726_v28 }
 0x1a3   :  { %1463 = vmatprep.subr.mxu1 %v1726_v28 }
 0x1a4   :  { %1464 = vmatpush3.msra.mxu1 %v211_v49  ;;  %v2027_v49 = vld [vmem:[%s2146_s4 + $0x48] sm:$0xff] }
 0x1a5   :  { %1466 = vmatmul.mubr.f32.vlgmr.msra.gmra.mxu1 %v1840_v22  ;;  %v1991_v22 = vld [vmem:[%s2146_s4 + $0x18] sm:$0xff]  ;;  %2153 = vst [vmem:[#allocation9_spill] sm:$0xff] %v2027_v49 }
 0x1a6   :  { %1485 = vmatprep.mubr.msk.f32.mxu1 %vm332_vm1, %v239_v12 }
 0x245   :  { %v1411_v52 = vpop.f32.mrf.mxu1 }
 0x246   :  { %v453_v28 = vadd.f32 %v1411_v52, %v1980_v51 }
 0x247   :  { %v447_v56 = vpop.f32.mrf.mxu1 }
 0x248   :  { %v1257_v57 = vmul.f32 -1.442695, %v453_v28  ;;  %v448_v58 = vadd.f32 %v447_v56, %v1985_v55 }
 0x249   :  { %v1414_v61 = vpop.f32.mrf.mxu1 }
 0x24a   :  { %1505 = vpow2.f32 %v1257_v57  ;;  %v1256_v63 = vmul.f32 -1.442695, %v448_v58  ;;  %v463_v2 = vadd.f32 %v1414_v61, %v1991_v22  ;;  %v2034_v57 = vld [vmem:[%s2146_s4 + $0x40] sm:$0xff] }
 0x24b   :  { %v457_v3 = vpop.f32.mrf.mxu1  ;;  %2154 = vst [vmem:[#allocation10_spill] sm:$0xff] %v2034_v57 }
 0x24c   :  { %1507 = vpow2.f32 %v1256_v63  ;;  %v1259_v7 = vmul.f32 -1.442695, %v463_v2  ;;  %v458_v8 = vadd.f32 %v457_v3, %v1997_v62  ;;  %v2039_v63 = vld [vmem:[%s2146_s4 + $0x58] sm:$0xff] }
 0x24d   :  { %v1417_v9 = vpop.f32.mrf.mxu1 }
 0x24e   :  { %1509 = vpow2.f32 %v1259_v7  ;;  %v1258_v12 = vmul.f32 -1.442695, %v458_v8  ;;  %v473_v13 = vadd.f32 %v1417_v9, %v2003_v4 }
 0x24f   :  { %v467_v14 = vpop.f32.mrf.mxu1 }
 0x250   :  { %1511 = vpow2.f32 %v1258_v12  ;;  %v1261_v20 = vmul.f32 -1.442695, %v473_v13  ;;  %v468_v21 = vadd.f32 %v467_v14, %v2009_v10 }
 0x251   :  { %v1420_v23 = vpop.f32.mrf.mxu1 }
 0x252   :  { %1513 = vpow2.f32 %v1261_v20  ;;  %v1260_v30 = vmul.f32 -1.442695, %v468_v21  ;;  %v483_v36 = vadd.f32 %v1420_v23, %v2015_v15  ;;  %v2046_v20 = vld [vmem:[%s2146_s4 + $0x50] sm:$0xff] }
 0x253   :  { %v477_v47 = vpop.f32.mrf.mxu1 }
 0x254   :  { %1515 = vpow2.f32 %v1260_v30  ;;  %v1263_v50 = vmul.f32 -1.442695, %v483_v36  ;;  %v478_v52 = vadd.f32 %v477_v47, %v2022_v42  ;;  %v2051_v30 = vld [vmem:[%s2146_s4 + $0x68] sm:$0xff] }
 0x255   :  { %v1423_v28 = vpop.f32.mrf.mxu1 }
 0x256   :  { %v493_v56 = vadd.f32 %v1423_v28, %v2027_v49  ;;  %1517 = vpow2.f32 %v1263_v50  ;;  %v1262_v8 = vmul.f32 -1.442695, %v478_v52 }
 0x257   :  { %v1506_v58 = vpop.eup %1505  ;;  %v487_v61 = vpop.f32.mrf.mxu1 }
 0x258   :  { %v575_v2 = vadd.f32 1.0, %v1506_v58  ;;  %v1265_v3 = vmul.f32 -1.442695, %v493_v56  ;;  %v488_v9 = vadd.f32 %v487_v61, %v2034_v57 }
 0x259   :  { %v1508_v7 = vpop.eup %1507  ;;  %v1426_v12 = vpop.f32.mrf.mxu1 }
 0x25a   :  { %1519 = vrcp.f32 %v575_v2  ;;  %v574_v13 = vadd.f32 1.0, %v1508_v7  ;;  %v503_v14 = vadd.f32 %v1426_v12, %v2039_v63  ;;  %v1264_v52 = vmul.f32 -1.442695, %v488_v9  ;;  %v2058_v7 = vld [vmem:[%s2146_s4 + $0x60] sm:$0xff] }
 0x25b   :  { %v1510_v21 = vpop.eup %1509  ;;  %1521 = vpow2.f32 %v1265_v3  ;;  %v497_v23 = vpop.f32.mrf.mxu1 }
 0x25c   :  { %1523 = vrcp.f32 %v574_v13  ;;  %v577_v36 = vadd.f32 1.0, %v1510_v21  ;;  %v1267_v47 = vmul.f32 -1.442695, %v503_v14  ;;  %v498_v28 = vadd.f32 %v497_v23, %v2046_v20 }
 0x25d   :  { %v1512_v50 = vpop.eup %1511  ;;  %1525 = vpow2.f32 %v1262_v8  ;;  %v1429_v56 = vpop.f32.mrf.mxu1  ;;  %v2063_v8 = vld [vmem:[%s2146_s4 + $0x78] sm:$0xff] }
 0x25e   :  { %1527 = vrcp.f32 %v577_v36  ;;  %v576_v58 = vadd.f32 1.0, %v1512_v50  ;;  %v513_v61 = vadd.f32 %v1429_v56, %v2051_v30  ;;  %2155 = vst [vmem:[#allocation11_spill] sm:$0xff] %v2063_v8  ;;  %v1266_v12 = vmul.f32 -1.442695, %v498_v28  ;;  %v2070_v50 = vld [vmem:[%s2146_s4 + $0x70] sm:$0xff]  ;;  %s1729_s4 = smov [#allocation5]  }
 0x25f   :  { %v1514_v2 = vpop.eup %1513  ;;  %1529 = vpow2.f32 %v1267_v47  ;;  %v507_v3 = vpop.f32.mrf.mxu1  ;;  %s1228_s11 = sshll.u32 %s1729_s4, 4  ;;  %s1229_s11 = int_to_ptr.vmem [resolvable:$true] %s1228_s11 }
 0x260   :  { %v1269_v9 = vmul.f32 -1.442695, %v513_v61  ;;  %1531 = vpow2.f32 %v1264_v52  ;;  %v579_v21 = vadd.f32 1.0, %v1514_v2  ;;  %v508_v23 = vadd.f32 %v507_v3, %v2058_v7  ;;  %s1699_s12 = scalar_lea.vmem %s1229_s11, 8192  ;;  %p1704_p6 = scmp.lt.s32.totalorder %s1229_s11, %s1229_s11 }
 0x261   :  { %v1432_v13 = vpop.f32.mrf.mxu1  ;;  %v1516_v14 = vpop.eup %1515  ;;  %1533 = vrcp.f32 %v576_v58  ;;  %p1700_p5 = scmp.ne.s32.totalorder %s1229_s11, %s1699_s12  ;;  %p1705_p7 = scmp.lt.s32.totalorder %s1699_s12, %s1699_s12 }
 0x262   :  { %v523_v36 = vadd.f32 %v1432_v13, %v2063_v8  ;;  %1535 = vpow2.f32 %v1269_v9  ;;  %v578_v57 = vadd.f32 1.0, %v1516_v14  ;;  %v1268_v61 = vmul.f32 -1.442695, %v508_v23 }
 0x263   :  { %v517_v47 = vpop.f32.mrf.mxu1  ;;  %1537 = vpow2.f32 %v1266_v12  ;;  %v1518_v28 = vpop.eup %1517  ;;  %p1706_p8 = por %p1705_p7, %p1704_p6 }
 0x264   :  { %v1271_v56 = vmul.f32 -1.442695, %v523_v36  ;;  %1539 = vrcp.f32 %v579_v21  ;;  %v518_v58 = vadd.f32 %v517_v47, %v2070_v50  ;;  %v581_v42 = vadd.f32 1.0, %v1518_v28 }
 0x265   :  { %v832_v52 = vpop.f32.mrf.mxu1  ;;  %p1707_p9 = pnand %p1706_p8, %p1700_p5 }
 0x266   :  { %v833_v2 = vadd.f32 %v832_v52, %v1852_v41  ;;  %1541 = vpow2.f32 %v1271_v56  ;;  %v1270_v12 = vmul.f32 -1.442695, %v518_v58 }
 0x267   :  { %v1520_v3 = vpop.eup %1519  ;;  %v1467_v9 = vpop.f32.mrf.mxu1  ;;  %1543 = vrcp.f32 %v578_v57 }
 0x268   :  { %v1522_v13 = vpop.eup %1521  ;;  %v836_v49 = vmax.f32 %v833_v2, 0.0  ;;  %629 = vperm.xlu1 %1503, %v1520_v3   ;;  %1545 = vpow2.f32 %v1268_v61 }
 0x269   :  { %v1524_v8 = vpop.eup %1523  ;;  %v583_v36 = vadd.f32 1.0, %v1522_v13 }
 0x26a   :  { %v1526_v14 = vpop.eup %1525  ;;  %624 = vperm.xlu0 %1504, %v1524_v8   ;;  %1468 = vmatprep.subr.mxu0 %v836_v49 }
 0x26b   :  { %v1528_v21 = vpop.eup %1527  ;;  %1547 = vrcp.f32 %v583_v36  ;;  %1494 = vmatprep.subr.mxu1 %v836_v49  ;;  %1469 = vmatpush3.msra.mxu0 %v836_v49  ;;  %v580_v47 = vadd.f32 1.0, %v1526_v14 }
 0x26c   :  { %v1530_v41 = vpop.eup %1529  ;;  %1495 = vmatpush3.msra.mxu1 %v836_v49  ;;  %639 = vperm.xlu1 %1503, %v1528_v21   ;;  %1549 = vrcp.f32 %v581_v42 }
 0x26d   :  { %v585_v23 = vadd.f32 1.0, %v1530_v41  ;;  %1471 = vmatmul.mubr.msk.f32.vlgmr.msra.gmra.mxu0 %vm332_vm1, %v1858_v53  ;;  %1486 = vmatmul.mubr.msk.f32.vlgmr.msra.gmra.mxu1 %vm332_vm1, %v1934_v16  ;;  %v1532_v57 = vpop.eup %1531  ;;  %1551 = vpow2.f32 %v1270_v12 }
 0x26e   :  { %1473 = vmatprep.mubr.msk.f32.mxu0 %vm332_vm1, %v1863_v54  ;;  %1488 = vmatprep.mubr.msk.f32.mxu1 %vm332_vm1, %v1940_v17  ;;  %v1534_v8 = vpop.eup %1533  ;;  %v582_v16 = vadd.f32 1.0, %v1532_v57 }
 0x26f   :  { %1553 = vrcp.f32 %v585_v23  ;;  %v1536_v49 = vpop.eup %1535 }
 0x270   :  { %634 = vperm.xlu1 %1503, %v1534_v8   ;;  %v587_v42 = vadd.f32 1.0, %v1536_v49  ;;  %v1538_v53 = vpop.eup %1537  ;;  %1555 = vrcp.f32 %v580_v47 }
 0x271   :  { %1474 = vmatmul.mubr.msk.f32.gmra.mxu0 %vm332_vm1, %v1873_v59  ;;  %1489 = vmatmul.mubr.msk.f32.gmra.mxu1 %vm332_vm1, %v1950_v29  ;;  %v1540_v54 = vpop.eup %1539  ;;  %v584_v29 = vadd.f32 1.0, %v1538_v53 }
 0x272   :  { %1476 = vmatprep.mubr.msk.f32.mxu0 %vm332_vm1, %v1879_v60  ;;  %1491 = vmatprep.mubr.msk.f32.mxu1 %vm332_vm1, %v1956_v35  ;;  %1557 = vrcp.f32 %v587_v42 }
 0x273   :  { %v1542_v17 = vpop.eup %1541  ;;  %1559 = vrcp.f32 %v582_v16 }
 0x274   :  { %649 = vperm.xlu1 %1503, %v1540_v54   ;;  %v589_v56 = vadd.f32 1.0, %v1542_v17  ;;  %v1544_v59 = vpop.eup %1543  ;;  %v1633_v54 = vld [vmem:[#allocation2 + $0xb0] sm:$0xff] }
 0x275   :  { %1477 = vmatmul.mubr.msk.f32.gmra.mxu0 %vm332_vm1, %v1889_v0  ;;  %1492 = vmatmul.mubr.msk.f32.gmra.mxu1 %vm332_vm1, %v1966_v48  ;;  %v1546_v60 = vpop.eup %1545 }
 0x276   :  { %1479 = vmatprep.mubr.msk.f32.mxu0 %vm332_vm1, %v1895_v1  ;;  %1561 = vrcp.f32 %v589_v56  ;;  %v586_v0 = vadd.f32 1.0, %v1546_v60  ;;  %v1634_v56 = vld [vmem:[#allocation2 + $0xb8] sm:$0xff] }
 0x277   :  { %1563 = vrcp.f32 %v584_v29  ;;  %v1635_v29 = vld [vmem:[#allocation2 + $0xd0] sm:$0xff] }
 0x278   :  { %v1548_v35 = vpop.eup %1547  ;;  %644 = vperm.xlu1 %1503, %v1544_v59   ;;  %1565 = vrcp.f32 %v586_v0  ;;  %v1637_v0 = vld [vmem:[#allocation2 + $0x80] sm:$0xff] }
 0x279   :  { %669 = vperm.xlu0 %1504, %v1548_v35   ;;  %1480 = vmatmul.mubr.msk.f32.gmra.mxu0 %vm332_vm1, %v1905_v5  ;;  %v1550_v52 = vpop.eup %1549  ;;  %v1636_v35 = vld [vmem:[#allocation2 + $0xd8] sm:$0xff] }
 0x27a   :  { %1482 = vmatprep.mubr.msk.f32.mxu0 %vm332_vm1, %v1911_v6  ;;  %v1552_v48 = vpop.eup %1551 }
 0x27b   :  { %v588_v1 = vadd.f32 1.0, %v1552_v48 }
 0x27c   :  { %v1554_v28 = vpop.eup %1553  ;;  %659 = vperm.xlu1 %1503, %v1550_v52  }
 0x27d   :  { %679 = vperm.xlu0 %1504, %v1554_v28   ;;  %1483 = vmatmul.mubr.msk.f32.gmra.mxu0 %vm332_vm1, %v1921_v11  ;;  %v1556_v61 = vpop.eup %1555  ;;  %1567 = vrcp.f32 %v588_v1  ;;  %v1638_v28 = vld [vmem:[#allocation2 + $0x88] sm:$0xff] }
 0x27f   :  { %v1558_v58 = vpop.eup %1557 }
 0x280   :  { %654 = vperm.xlu1 %1503, %v1556_v61   ;;  %v1560_v5 = vpop.eup %1559  ;;  %v1639_v61 = vld [vmem:[#allocation2 + $0xf0] sm:$0xff] }
 0x281   :  { %689 = vperm.xlu0 %1504, %v1558_v58  }
 0x283   :  { %v1562_v2 = vpop.eup %1561 }
 0x284   :  { %664 = vperm.xlu1 %1503, %v1560_v5   ;;  %v1564_v3 = vpop.eup %1563  ;;  %v1640_v5 = vld [vmem:[#allocation2 + $0xf8] sm:$0xff] }
 0x285   :  { %699 = vperm.xlu0 %1504, %v1562_v2   ;;  %v1566_v6 = vpop.eup %1565  ;;  %v1641_v2 = vld [vmem:[#allocation2 + $0xa0] sm:$0xff] }
 0x288   :  { %674 = vperm.xlu1 %1503, %v1564_v3  }
 0x28a   :  { %v1568_v9 = vpop.eup %1567 }
 0x28c   :  { %684 = vperm.xlu1 %1503, %v1566_v6   ;;  %v1642_v6 = vld [vmem:[#allocation2 + $0xa8] sm:$0xff] }
 0x290   :  { %694 = vperm.xlu1 %1503, %v1568_v9  }
 0x2e3   :  { %v630_v13 = vpop.permute.xlu1 %629 }
 0x2e4   :  { %v704_v11 = vmul.f32 %v630_v13, %v1809_v43  ;;  %v705_v36 = vmul.f32 %v630_v13, %v1811_v44 }
 0x2e5   :  { %v625_v14 = vpop.permute.xlu0 %624 }
 0x2e6   :  { %736 = vst [vmem:[#allocation5 + $0x10] sm:$0xff] %v704_v11  ;;  %737 = vst [vmem:[#allocation5 + $0x18] sm:$0xff] %v705_v36  ;;  %v702_v12 = vmul.f32 %v625_v14, %v1813_v45  ;;  %v703_v21 = vmul.f32 %v625_v14, %v1815_v46  ;;  %v1643_v11 = vld [vmem:[#allocation2 + $0xc0] sm:$0xff]  ;;  %v1644_v14 = vld [vmem:[#allocation2 + $0xc8] sm:$0xff] }
 0x2e7   :  { %v640_v41 = vpop.permute.xlu1 %639 }
 0x2e8   :  { %734 = vst [vmem:[#allocation5] sm:$0xff] %v702_v12  ;;  %735 = vst [vmem:[#allocation5 + $0x8] sm:$0xff] %v703_v21  ;;  %v708_v23 = vmul.f32 %v640_v41, %v1797_v37  ;;  %v709_v57 = vmul.f32 %v640_v41, %v1799_v38  ;;  %v1645_v41 = vld [vmem:[#allocation2 + $0xe0] sm:$0xff] }
 0x2ea   :  { %740 = vst [vmem:[#allocation5 + $0x30] sm:$0xff] %v708_v23  ;;  %741 = vst [vmem:[#allocation5 + $0x38] sm:$0xff] %v709_v57  ;;  %v1646_v57 = vld [vmem:[#allocation2 + $0xe8] sm:$0xff] }
 0x2eb   :  { %v635_v47 = vpop.permute.xlu1 %634 }
 0x2ec   :  { %v706_v43 = vmul.f32 %v635_v47, %v1801_v39  ;;  %v707_v44 = vmul.f32 %v635_v47, %v1803_v40 }
 0x2ee   :  { %738 = vst [vmem:[#allocation5 + $0x20] sm:$0xff] %v706_v43  ;;  %739 = vst [vmem:[#allocation5 + $0x28] sm:$0xff] %v707_v44 }
 0x2ef   :  { %v650_v8 = vpop.permute.xlu1 %649 }
 0x2f0   :  { %v712_v45 = vmul.f32 %v650_v8, %v1785_v31  ;;  %v713_v46 = vmul.f32 %v650_v8, %v1787_v32 }
 0x2f2   :  { %744 = vst [vmem:[#allocation5 + $0x50] sm:$0xff] %v712_v45  ;;  %745 = vst [vmem:[#allocation5 + $0x58] sm:$0xff] %v713_v46 }
 0x2f3   :  { %v645_v49 = vpop.permute.xlu1 %644 }
 0x2f4   :  { %v670_v37 = vpop.permute.xlu0 %669  ;;  %v710_v38 = vmul.f32 %v645_v49, %v1789_v33  ;;  %v711_v42 = vmul.f32 %v645_v49, %v1791_v34 }
 0x2f5   :  { %v720_v53 = vmul.f32 %v670_v37, %v1766_v18  ;;  %v721_v39 = vmul.f32 %v670_v37, %v1768_v19 }
 0x2f6   :  { %742 = vst [vmem:[#allocation5 + $0x40] sm:$0xff] %v710_v38  ;;  %743 = vst [vmem:[#allocation5 + $0x48] sm:$0xff] %v711_v42 }
 0x2f7   :  { %752 = vst [vmem:[#allocation5 + $0x90] sm:$0xff] %v720_v53  ;;  %753 = vst [vmem:[#allocation5 + $0x98] sm:$0xff] %v721_v39  ;;  %v660_v40 = vpop.permute.xlu1 %659 }
 0x2f8   :  { %v680_v31 = vpop.permute.xlu0 %679  ;;  %v716_v32 = vmul.f32 %v660_v40, %v1772_v24  ;;  %v717_v16 = vmul.f32 %v660_v40, %v1774_v25 }
 0x2f9   :  { %v724_v17 = vmul.f32 %v1633_v54, %v680_v31  ;;  %v725_v33 = vmul.f32 %v1634_v56, %v680_v31 }
 0x2fa   :  { %748 = vst [vmem:[#allocation5 + $0x70] sm:$0xff] %v716_v32  ;;  %749 = vst [vmem:[#allocation5 + $0x78] sm:$0xff] %v717_v16 }
 0x2fb   :  { %756 = vst [vmem:[#allocation5 + $0xb0] sm:$0xff] %v724_v17  ;;  %757 = vst [vmem:[#allocation5 + $0xb8] sm:$0xff] %v725_v33  ;;  %v655_v18 = vpop.permute.xlu1 %654 }
 0x2fc   :  { %v690_v19 = vpop.permute.xlu0 %689  ;;  %v714_v34 = vmul.f32 %v655_v18, %v1776_v26  ;;  %v715_v59 = vmul.f32 %v655_v18, %v1778_v27 }
 0x2fd   :  { %v728_v60 = vmul.f32 %v1635_v29, %v690_v19  ;;  %v729_v24 = vmul.f32 %v1636_v35, %v690_v19 }
 0x2fe   :  { %746 = vst [vmem:[#allocation5 + $0x60] sm:$0xff] %v714_v34  ;;  %747 = vst [vmem:[#allocation5 + $0x68] sm:$0xff] %v715_v59 }
 0x2ff   :  { %760 = vst [vmem:[#allocation5 + $0xd0] sm:$0xff] %v728_v60  ;;  %761 = vst [vmem:[#allocation5 + $0xd8] sm:$0xff] %v729_v24  ;;  %v665_v25 = vpop.permute.xlu1 %664 }
 0x300   :  { %v700_v52 = vpop.permute.xlu0 %699  ;;  %v718_v48 = vmul.f32 %v1637_v0, %v665_v25  ;;  %v719_v1 = vmul.f32 %v1638_v28, %v665_v25  ;;  %v2156_v25 = vld [vmem:[#allocation8_spill] sm:$0xff] }
 0x301   :  { %v732_v58 = vmul.f32 %v1639_v61, %v700_v52  ;;  %v733_v26 = vmul.f32 %v1640_v5, %v700_v52 }
 0x302   :  { %750 = vst [vmem:[#allocation5 + $0x80] sm:$0xff] %v718_v48  ;;  %751 = vst [vmem:[#allocation5 + $0x88] sm:$0xff] %v719_v1  ;;  %v2157_v48 = vld [vmem:[#allocation11_spill] sm:$0xff] }
 0x303   :  { %764 = vst [vmem:[#allocation5 + $0xf0] sm:$0xff] %v732_v58  ;;  %765 = vst [vmem:[#allocation5 + $0xf8] sm:$0xff] %v733_v26  ;;  %v675_v27 = vpop.permute.xlu1 %674 }
 0x304   :  { %v722_v3 = vmul.f32 %v1641_v2, %v675_v27  ;;  %v723_v9 = vmul.f32 %v1642_v6, %v675_v27 }
 0x306   :  { %754 = vst [vmem:[#allocation5 + $0xa0] sm:$0xff] %v722_v3  ;;  %755 = vst [vmem:[#allocation5 + $0xa8] sm:$0xff] %v723_v9 }
 0x307   :  { %v685_v13 = vpop.permute.xlu1 %684 }
 0x308   :  { %v726_v36 = vmul.f32 %v1643_v11, %v685_v13  ;;  %v727_v12 = vmul.f32 %v1644_v14, %v685_v13  ;;  %v2158_v11 = vld [vmem:[#allocation9_spill] sm:$0xff] }
 0x30a   :  { %758 = vst [vmem:[#allocation5 + $0xc0] sm:$0xff] %v726_v36  ;;  %759 = vst [vmem:[#allocation5 + $0xc8] sm:$0xff] %v727_v12 }
 0x30b   :  { %v695_v21 = vpop.permute.xlu1 %694 }
 0x30c   :  { %v730_v23 = vmul.f32 %v1645_v41, %v695_v21  ;;  %v731_v47 = vmul.f32 %v1646_v57, %v695_v21  ;;  %v2159_v41 = vld [vmem:[#allocation10_spill] sm:$0xff] }
 0x30e   :  { %762 = vst [vmem:[#allocation5 + $0xe0] sm:$0xff] %v730_v23  ;;  %763 = vst [vmem:[#allocation5 + $0xe8] sm:$0xff] %v731_v47 }
 0x32d   :  { %v1472_v43 = vpop.f32.mrf.mxu0  ;;  %v1487_v44 = vpop.f32.mrf.mxu1 }
 0x32e   :  { %v909_v8 = vadd.f32 %v1472_v43, %v1980_v51  ;;  %v959_v45 = vadd.f32 %v1487_v44, %v2039_v63 }
 0x32f   :  { %v903_v46 = vpop.f32.mrf.mxu0  ;;  %v953_v49 = vpop.f32.mrf.mxu1 }
 0x330   :  { %v1289_v37 = vmul.f32 -1.442695, %v909_v8  ;;  %v904_v38 = vadd.f32 %v903_v46, %v1985_v55  ;;  %v1299_v42 = vmul.f32 -1.442695, %v959_v45  ;;  %v954_v53 = vadd.f32 %v953_v49, %v2046_v20 }
 0x331   :  { %v1475_v39 = vpop.f32.mrf.mxu0  ;;  %v1490_v40 = vpop.f32.mrf.mxu1 }
 0x332   :  { %1569 = vpow2.f32 %v1289_v37  ;;  %v1288_v31 = vmul.f32 -1.442695, %v904_v38  ;;  %v1298_v32 = vmul.f32 -1.442695, %v954_v53  ;;  %v919_v16 = vadd.f32 %v1475_v39, %v1991_v22 }
 0x333   :  { %1571 = vpow2.f32 %v1299_v42  ;;  %v913_v54 = vpop.f32.mrf.mxu0  ;;  %v969_v51 = vadd.f32 %v1490_v40, %v2051_v30  ;;  %v963_v63 = vpop.f32.mrf.mxu1 }
 0x334   :  { %1573 = vpow2.f32 %v1288_v31  ;;  %v1291_v17 = vmul.f32 -1.442695, %v919_v16  ;;  %v914_v56 = vadd.f32 %v913_v54, %v1997_v62  ;;  %v964_v55 = vadd.f32 %v963_v63, %v2058_v7 }
 0x335   :  { %1575 = vpow2.f32 %v1298_v32  ;;  %v1301_v20 = vmul.f32 -1.442695, %v969_v51  ;;  %v1478_v33 = vpop.f32.mrf.mxu0  ;;  %v1493_v62 = vpop.f32.mrf.mxu1 }
 0x336   :  { %1577 = vpow2.f32 %v1291_v17  ;;  %v1290_v18 = vmul.f32 -1.442695, %v914_v56  ;;  %v929_v19 = vadd.f32 %v1478_v33, %v2003_v4  ;;  %v1300_v22 = vmul.f32 -1.442695, %v964_v55 }
 0x337   :  { %1579 = vpow2.f32 %v1301_v20  ;;  %v923_v34 = vpop.f32.mrf.mxu0  ;;  %v979_v28 = vadd.f32 %v1493_v62, %v2157_v48  ;;  %v973_v1 = vpop.f32.mrf.mxu1  ;;  %v1648_v48 = vld [vmem:[#allocation2 + $0x118] sm:$0xff] }
 0x338   :  { %1581 = vpow2.f32 %v1290_v18  ;;  %v1293_v59 = vmul.f32 -1.442695, %v929_v19  ;;  %v924_v30 = vadd.f32 %v923_v34, %v2009_v10  ;;  %v974_v26 = vadd.f32 %v973_v1, %v2070_v50 }
 0x339   :  { %v1481_v29 = vpop.f32.mrf.mxu0  ;;  %1583 = vpow2.f32 %v1300_v22  ;;  %v1303_v6 = vmul.f32 -1.442695, %v979_v28 }
 0x33a   :  { %v939_v60 = vadd.f32 %v1481_v29, %v2015_v15  ;;  %v1292_v7 = vmul.f32 -1.442695, %v924_v30  ;;  %1585 = vpow2.f32 %v1293_v59  ;;  %v1302_v57 = vmul.f32 -1.442695, %v974_v26  ;;  %v1651_v26 = vld [vmem:[#allocation2 + $0x1b0] sm:$0xff] }
 0x33b   :  { %v933_v35 = vpop.f32.mrf.mxu0 }
 0x33c   :  { %v1295_v24 = vmul.f32 -1.442695, %v939_v60  ;;  %v934_v52 = vadd.f32 %v933_v35, %v2156_v25  ;;  %1587 = vpow2.f32 %v1292_v7 }
 0x33d   :  { %v1484_v4 = vpop.f32.mrf.mxu0 }
 0x33e   :  { %v1294_v0 = vmul.f32 -1.442695, %v934_v52  ;;  %1589 = vpow2.f32 %v1295_v24  ;;  %v949_v36 = vadd.f32 %v1484_v4, %v2158_v11  ;;  %v1654_v11 = vld [vmem:[#allocation2 + $0x1a8] sm:$0xff] }
 0x33f   :  { %v1570_v61 = vpop.eup %1569  ;;  %v943_v3 = vpop.f32.mrf.mxu0 }
 0x340   :  { %v1572_v58 = vpop.eup %1571  ;;  %v1031_v10 = vadd.f32 1.0, %v1570_v61  ;;  %1591 = vpow2.f32 %v1294_v0  ;;  %v944_v23 = vadd.f32 %v943_v3, %v2159_v41  ;;  %v1297_v50 = vmul.f32 -1.442695, %v949_v36  ;;  %v1647_v0 = vld [vmem:[#allocation2 + $0x110] sm:$0xff]  ;;  %v1649_v61 = vld [vmem:[#allocation2 + $0x100] sm:$0xff]  ;;  %v1656_v41 = vld [vmem:[#allocation2 + $0x138] sm:$0xff] }
 0x341   :  { %v1574_v5 = vpop.eup %1573  ;;  %v1041_v15 = vadd.f32 1.0, %v1572_v58 }
 0x342   :  { %v1576_v27 = vpop.eup %1575  ;;  %1593 = vrcp.f32 %v1031_v10  ;;  %v1030_v2 = vadd.f32 1.0, %v1574_v5  ;;  %v1296_v45 = vmul.f32 -1.442695, %v944_v23  ;;  %v1650_v10 = vld [vmem:[#allocation2 + $0x108] sm:$0xff] }
 0x343   :  { %v1578_v9 = vpop.eup %1577  ;;  %1595 = vrcp.f32 %v1041_v15  ;;  %v1040_v13 = vadd.f32 1.0, %v1576_v27 }
 0x344   :  { %v1580_v14 = vpop.eup %1579  ;;  %1597 = vrcp.f32 %v1030_v2  ;;  %v1033_v12 = vadd.f32 1.0, %v1578_v9  ;;  %v1652_v2 = vld [vmem:[#allocation2 + $0x1b8] sm:$0xff]  ;;  %v1653_v9 = vld [vmem:[#allocation2 + $0x1a0] sm:$0xff] }
 0x345   :  { %v1582_v21 = vpop.eup %1581  ;;  %v1043_v47 = vadd.f32 1.0, %v1580_v14  ;;  %1599 = vpow2.f32 %v1303_v6 }
 0x346   :  { %1601 = vrcp.f32 %v1040_v13  ;;  %v1584_v43 = vpop.eup %1583  ;;  %v1032_v44 = vadd.f32 1.0, %v1582_v21 }
 0x347   :  { %1603 = vrcp.f32 %v1033_v12  ;;  %v1586_v8 = vpop.eup %1585  ;;  %v1042_v46 = vadd.f32 1.0, %v1584_v43  ;;  %v1655_v12 = vld [vmem:[#allocation2 + $0x130] sm:$0xff]  ;;  %v1658_v43 = vld [vmem:[#allocation2 + $0x128] sm:$0xff] }
 0x348   :  { %1605 = vpow2.f32 %v1302_v57  ;;  %v1035_v37 = vadd.f32 1.0, %v1586_v8 }
 0x349   :  { %1607 = vrcp.f32 %v1043_v47  ;;  %v1588_v49 = vpop.eup %1587  ;;  %v1657_v47 = vld [vmem:[#allocation2 + $0x120] sm:$0xff] }
 0x34a   :  { %1609 = vpow2.f32 %v1297_v50  ;;  %v1034_v39 = vadd.f32 1.0, %v1588_v49  ;;  %v1660_v49 = vld [vmem:[#allocation2 + $0x1d8] sm:$0xff] }
 0x34b   :  { %1611 = vrcp.f32 %v1032_v44  ;;  %v1590_v38 = vpop.eup %1589 }
 0x34c   :  { %1613 = vpow2.f32 %v1296_v45  ;;  %v1037_v31 = vadd.f32 1.0, %v1590_v38  ;;  %v1659_v45 = vld [vmem:[#allocation2 + $0x1d0] sm:$0xff] }
 0x34d   :  { %v1592_v42 = vpop.eup %1591  ;;  %1615 = vrcp.f32 %v1042_v46 }
 0x34e   :  { %1617 = vrcp.f32 %v1035_v37  ;;  %v1036_v51 = vadd.f32 1.0, %v1592_v42  ;;  %v1661_v42 = vld [vmem:[#allocation2 + $0x1c0] sm:$0xff] }
 0x34f   :  { %v1594_v53 = vpop.eup %1593  ;;  %1619 = vrcp.f32 %v1034_v39  ;;  %v1662_v39 = vld [vmem:[#allocation2 + $0x1c8] sm:$0xff] }
 0x350   :  { %v1596_v40 = vpop.eup %1595  ;;  %1085 = vperm.xlu0 %1504, %v1594_v53   ;;  %1621 = vrcp.f32 %v1037_v31 }
 0x351   :  { %v1598_v32 = vpop.eup %1597  ;;  %1623 = vrcp.f32 %v1036_v51 }
 0x352   :  { %1080 = vperm.xlu1 %1503, %v1598_v32   ;;  %v1600_v16 = vpop.eup %1599  ;;  %v1663_v32 = vld [vmem:[#allocation2 + $0x150] sm:$0xff] }
 0x353   :  { %v1602_v54 = vpop.eup %1601  ;;  %v1045_v20 = vadd.f32 1.0, %v1600_v16 }
 0x354   :  { %1135 = vperm.xlu0 %1504, %v1596_v40   ;;  %v1604_v63 = vpop.eup %1603 }
 0x355   :  { %v1606_v17 = vpop.eup %1605 }
 0x356   :  { %1130 = vperm.xlu1 %1503, %v1602_v54   ;;  %v1608_v56 = vpop.eup %1607  ;;  %v1044_v30 = vadd.f32 1.0, %v1606_v17  ;;  %v1664_v54 = vld [vmem:[#allocation2 + $0x158] sm:$0xff]  ;;  %v1665_v17 = vld [vmem:[#allocation2 + $0x140] sm:$0xff] }
 0x357   :  { %v1610_v55 = vpop.eup %1609 }
 0x358   :  { %1095 = vperm.xlu0 %1504, %v1604_v63   ;;  %v1612_v33 = vpop.eup %1611  ;;  %v1039_v18 = vadd.f32 1.0, %v1610_v55  ;;  %v1666_v55 = vld [vmem:[#allocation2 + $0x148] sm:$0xff] }
 0x359   :  { %v1614_v19 = vpop.eup %1613 }
 0x35a   :  { %1090 = vperm.xlu1 %1503, %v1612_v33   ;;  %1625 = vrcp.f32 %v1039_v18  ;;  %v1038_v22 = vadd.f32 1.0, %v1614_v19  ;;  %v1616_v34 = vpop.eup %1615  ;;  %v1667_v18 = vld [vmem:[#allocation2 + $0x170] sm:$0xff] }
 0x35b   :  { %1627 = vrcp.f32 %v1045_v20  ;;  %v1618_v59 = vpop.eup %1617 }
 0x35c   :  { %1145 = vperm.xlu0 %1504, %v1608_v56   ;;  %1629 = vrcp.f32 %v1038_v22  ;;  %v1620_v29 = vpop.eup %1619  ;;  %v1668_v22 = vld [vmem:[#allocation2 + $0x178] sm:$0xff] }
 0x35d   :  { %v1622_v60 = vpop.eup %1621  ;;  %1631 = vrcp.f32 %v1044_v30  ;;  %v1669_v30 = vld [vmem:[#allocation2 + $0x160] sm:$0xff] }
 0x35e   :  { %1140 = vperm.xlu1 %1503, %v1616_v34   ;;  %v1624_v62 = vpop.eup %1623 }
 0x360   :  { %1105 = vperm.xlu0 %1504, %v1618_v59  }
 0x362   :  { %1100 = vperm.xlu1 %1503, %v1620_v29  }
 0x364   :  { %1115 = vperm.xlu0 %1504, %v1622_v60   ;;  %v1670_v60 = vld [vmem:[#allocation2 + $0x168] sm:$0xff] }
 0x366   :  { %1110 = vperm.xlu1 %1503, %v1624_v62  }
 0x367   :  { %v1626_v7 = vpop.eup %1625 }
 0x368   :  { %v1628_v35 = vpop.eup %1627  ;;  %1125 = vperm.xlu0 %1504, %v1626_v7  }
 0x369   :  { %v1630_v24 = vpop.eup %1629 }
 0x36a   :  { %1120 = vperm.xlu1 %1503, %v1630_v24   ;;  %v1632_v25 = vpop.eup %1631 }
 0x36c   :  { %1155 = vperm.xlu0 %1504, %v1628_v35   ;;  %v1671_v35 = vld [vmem:[#allocation2 + $0x190] sm:$0xff] }
 0x36e   :  { %1150 = vperm.xlu1 %1503, %v1632_v25   ;;  %v1672_v25 = vld [vmem:[#allocation2 + $0x198] sm:$0xff] }
 0x3cb   :  { %v1086_v52 = vpop.permute.xlu0 %1085 }
 0x3cc   :  { %v1160_v4 = vmul.f32 %v1647_v0, %v1086_v52  ;;  %v1161_v28 = vmul.f32 %v1648_v48, %v1086_v52 }
 0x3cd   :  { %v1081_v1 = vpop.permute.xlu1 %1080 }
 0x3ce   :  { %1193 = vst [vmem:[#allocation5 + $0x110] sm:$0xff] %v1160_v4  ;;  %1194 = vst [vmem:[#allocation5 + $0x118] sm:$0xff] %v1161_v28  ;;  %v1158_v58 = vmul.f32 %v1649_v61, %v1081_v1  ;;  %v1159_v5 = vmul.f32 %v1650_v10, %v1081_v1  ;;  %v1673_v4 = vld [vmem:[#allocation2 + $0x180] sm:$0xff]  ;;  %v1674_v28 = vld [vmem:[#allocation2 + $0x188] sm:$0xff] }
 0x3cf   :  { %v1136_v15 = vpop.permute.xlu0 %1135 }
 0x3d0   :  { %1191 = vst [vmem:[#allocation5 + $0x100] sm:$0xff] %v1158_v58  ;;  %1192 = vst [vmem:[#allocation5 + $0x108] sm:$0xff] %v1159_v5  ;;  %v1180_v27 = vmul.f32 %v1651_v26, %v1136_v15  ;;  %v1181_v3 = vmul.f32 %v1652_v2, %v1136_v15  ;;  %v1675_v58 = vld [vmem:[#allocation2 + $0x1f0] sm:$0xff]  ;;  %v1676_v5 = vld [vmem:[#allocation2 + $0x1f8] sm:$0xff] }
 0x3d1   :  { %v1131_v6 = vpop.permute.xlu1 %1130 }
 0x3d2   :  { %1213 = vst [vmem:[#allocation5 + $0x1b0] sm:$0xff] %v1180_v27  ;;  %1214 = vst [vmem:[#allocation5 + $0x1b8] sm:$0xff] %v1181_v3  ;;  %v1178_v13 = vmul.f32 %v1653_v9, %v1131_v6  ;;  %v1179_v36 = vmul.f32 %v1654_v11, %v1131_v6  ;;  %v1677_v27 = vld [vmem:[#allocation2 + $0x1e0] sm:$0xff]  ;;  %v1678_v3 = vld [vmem:[#allocation2 + $0x1e8] sm:$0xff] }
 0x3d3   :  { %v1096_v14 = vpop.permute.xlu0 %1095 }
 0x3d4   :  { %1211 = vst [vmem:[#allocation5 + $0x1a0] sm:$0xff] %v1178_v13  ;;  %1212 = vst [vmem:[#allocation5 + $0x1a8] sm:$0xff] %v1179_v36  ;;  %v1164_v21 = vmul.f32 %v1655_v12, %v1096_v14  ;;  %v1165_v23 = vmul.f32 %v1656_v41, %v1096_v14 }
 0x3d5   :  { %v1091_v57 = vpop.permute.xlu1 %1090 }
 0x3d6   :  { %1197 = vst [vmem:[#allocation5 + $0x130] sm:$0xff] %v1164_v21  ;;  %1198 = vst [vmem:[#allocation5 + $0x138] sm:$0xff] %v1165_v23  ;;  %v1162_v50 = vmul.f32 %v1657_v47, %v1091_v57  ;;  %v1163_v44 = vmul.f32 %v1658_v43, %v1091_v57 }
 0x3d7   :  { %v1146_v8 = vpop.permute.xlu0 %1145 }
 0x3d8   :  { %1195 = vst [vmem:[#allocation5 + $0x120] sm:$0xff] %v1162_v50  ;;  %1196 = vst [vmem:[#allocation5 + $0x128] sm:$0xff] %v1163_v44  ;;  %v1184_v46 = vmul.f32 %v1659_v45, %v1146_v8  ;;  %v1185_v37 = vmul.f32 %v1660_v49, %v1146_v8 }
 0x3d9   :  { %v1141_v38 = vpop.permute.xlu1 %1140 }
 0x3da   :  { %1217 = vst [vmem:[#allocation5 + $0x1d0] sm:$0xff] %v1184_v46  ;;  %1218 = vst [vmem:[#allocation5 + $0x1d8] sm:$0xff] %v1185_v37  ;;  %v1182_v53 = vmul.f32 %v1661_v42, %v1141_v38  ;;  %v1183_v40 = vmul.f32 %v1662_v39, %v1141_v38 }
 0x3db   :  { %v1106_v31 = vpop.permute.xlu0 %1105 }
 0x3dc   :  { %1215 = vst [vmem:[#allocation5 + $0x1c0] sm:$0xff] %v1182_v53  ;;  %1216 = vst [vmem:[#allocation5 + $0x1c8] sm:$0xff] %v1183_v40  ;;  %v1168_v16 = vmul.f32 %v1663_v32, %v1106_v31  ;;  %v1169_v51 = vmul.f32 %v1664_v54, %v1106_v31 }
 0x3dd   :  { %v1101_v63 = vpop.permute.xlu1 %1100 }
 0x3de   :  { %1201 = vst [vmem:[#allocation5 + $0x150] sm:$0xff] %v1168_v16  ;;  %1202 = vst [vmem:[#allocation5 + $0x158] sm:$0xff] %v1169_v51  ;;  %v1166_v56 = vmul.f32 %v1665_v17, %v1101_v63  ;;  %v1167_v20 = vmul.f32 %v1666_v55, %v1101_v63 }
 0x3df   :  { %v1116_v33 = vpop.permute.xlu0 %1115 }
 0x3e0   :  { %1199 = vst [vmem:[#allocation5 + $0x140] sm:$0xff] %v1166_v56  ;;  %1200 = vst [vmem:[#allocation5 + $0x148] sm:$0xff] %v1167_v20  ;;  %v1172_v19 = vmul.f32 %v1667_v18, %v1116_v33  ;;  %v1173_v34 = vmul.f32 %v1668_v22, %v1116_v33 }
 0x3e1   :  { %v1111_v59 = vpop.permute.xlu1 %1110 }
 0x3e2   :  { %1205 = vst [vmem:[#allocation5 + $0x170] sm:$0xff] %v1172_v19  ;;  %1206 = vst [vmem:[#allocation5 + $0x178] sm:$0xff] %v1173_v34  ;;  %v1170_v29 = vmul.f32 %v1669_v30, %v1111_v59  ;;  %v1171_v62 = vmul.f32 %v1670_v60, %v1111_v59 }
 0x3e3   :  { %v1126_v7 = vpop.permute.xlu0 %1125 }
 0x3e4   :  { %1203 = vst [vmem:[#allocation5 + $0x160] sm:$0xff] %v1170_v29  ;;  %1204 = vst [vmem:[#allocation5 + $0x168] sm:$0xff] %v1171_v62  ;;  %v1176_v24 = vmul.f32 %v1671_v35, %v1126_v7  ;;  %v1177_v52 = vmul.f32 %v1672_v25, %v1126_v7 }
 0x3e5   :  { %v1121_v0 = vpop.permute.xlu1 %1120 }
 0x3e6   :  { %1209 = vst [vmem:[#allocation5 + $0x190] sm:$0xff] %v1176_v24  ;;  %1210 = vst [vmem:[#allocation5 + $0x198] sm:$0xff] %v1177_v52  ;;  %v1174_v48 = vmul.f32 %v1673_v4, %v1121_v0  ;;  %v1175_v1 = vmul.f32 %v1674_v28, %v1121_v0 }
 0x3e7   :  { %v1156_v61 = vpop.permute.xlu0 %1155 }
 0x3e8   :  { %1207 = vst [vmem:[#allocation5 + $0x180] sm:$0xff] %v1174_v48  ;;  %1208 = vst [vmem:[#allocation5 + $0x188] sm:$0xff] %v1175_v1  ;;  %v1188_v10 = vmul.f32 %v1675_v58, %v1156_v61  ;;  %v1189_v15 = vmul.f32 %v1676_v5, %v1156_v61 }
 0x3e9   :  { %v1151_v26 = vpop.permute.xlu1 %1150 }
 0x3ea   :  { %1221 = vst [vmem:[#allocation5 + $0x1f0] sm:$0xff] %v1188_v10  ;;  %1222 = vst [vmem:[#allocation5 + $0x1f8] sm:$0xff] %v1189_v15  ;;  %v1186_v2 = vmul.f32 %v1677_v27, %v1151_v26  ;;  %v1187_v6 = vmul.f32 %v1678_v3, %v1151_v26 }
 0x3ec   :  { %1219 = vst [vmem:[#allocation5 + $0x1e0] sm:$0xff] %v1186_v2  ;;  %1220 = vst [vmem:[#allocation5 + $0x1e8] sm:$0xff] %v1187_v6 }
 0x3ed   :  { %1710 = shalt.err (!%p1707_p9)
}
 0x3ee   :  { %1234 = dma.vmem_to_hbm [thread:$0]  %s1229_s11, 8192, %s2147_s5, [#allocation4], %s1724_s21, %s1724_s21, %s1725_s22  }
 0x3ef   :  { %1721 = dma.done.wait [#allocation4], 8192  }
 0x3f0   :  { %1722 = vsyncadd [#allocation4], 4294959104 }
 0x3f1   :  { %1238 = vsyncpa [#allocation3], 1 }
 0x3f2   :  { %1239 = vsyncpa [#allocation4], 1 }

</bundles_post_ra>
